<compile_context>
chip_gen: v6e
topology: v6e:2x2x1
jax: 0.10.0
libtpu: 0.0.40
codegen_flags: <defaults>
</compile_context>

<pallas_src>
import jax
import jax.numpy as jnp
import numpy as np
from jax.experimental import pallas as pl
from jax.experimental.pallas import tpu as pltpu

_EPS = 1e-5  # nn.BatchNorm2d default eps


# ----------------------------- fused Pallas kernel ----------------------------- #

def _res_block_up_kernel(xp_ref, wc1_ref, w2b_ref, sel_ref, selt_ref,
                         g1_ref, b1_ref, g2_ref, b2_ref, out_ref, mpad_ref):
    """Fused ResBlockUp on the packed, H-padded, already x2-upsampled input.

    xp_ref   : (N, H2+2, W2*Cin)   bf16  -- lanes pack (x, cin), rows H-padded by 1
    wc1_ref  : (3, W2*Cin, 2*W2*Cout) bf16 -- banded conv1 (+skip in cols [W2*Cout:])
    w2b_ref  : (3, W2*Cout, W2*Cout)  bf16 -- banded conv2
    sel_ref  : (W2*Cout, Cout) f32  -- lane -> channel selector (stats reduce)
    selt_ref : (Cout, W2*Cout) f32  -- channel -> lane broadcaster
    out_ref  : (N*H2, W2*Cout) f32  -- lane-dense output slab
    mpad_ref : (N, H2+2, W2*Cout) bf16 scratch (H-padded main activations)
    """
    N, Hp, _ = xp_ref.shape
    H = Hp - 2
    WCout = out_ref.shape[-1]
    Cout = sel_ref.shape[-1]
    P = out_ref.shape[0] * (WCout // Cout)          # N * H2 * W2 pixels
    inv_n = 1.0 / P

    def rows(ref, dy):
        # all output rows' source rows for vertical tap dy: (N, H, K) -> (N*H, K)
        v = ref[:, dy:dy + H, :]
        return v.reshape(N * H, v.shape[-1])

    def bn_relu(v, g_ref, b_ref):
        # training-mode BatchNorm2d (biased batch stats) + ReLU on a packed
        # (rows, W*Cout) slab; channel of lane l is l % Cout.
        stats = jnp.concatenate(
            [jnp.sum(v, axis=0, keepdims=True),
             jnp.sum(v * v, axis=0, keepdims=True)], axis=0)           # (2, W*Cout)
        ch = jnp.dot(stats, sel_ref[...],
                     preferred_element_type=jnp.float32) * inv_n        # (2, Cout)
        mean = ch[0:1]
        var = jnp.maximum(ch[1:2] - mean * mean, 0.0)                    # clamp cancellation
        scale = g_ref[...] * jax.lax.rsqrt(var + _EPS)                   # (1, Cout)
        shift = b_ref[...] - mean * scale
        ss = jnp.dot(jnp.concatenate([scale, shift], axis=0), selt_ref[...],
                     preferred_element_type=jnp.float32)                 # (2, W*Cout)
        return jnp.maximum(v * ss[0:1] + ss[1:2], 0.0)

    # conv1 (3x3) + folded 1x1 skip: three banded matmuls, one per row offset.
    both = jnp.dot(rows(xp_ref, 0), wc1_ref[0], preferred_element_type=jnp.float32)
    both += jnp.dot(rows(xp_ref, 1), wc1_ref[1], preferred_element_type=jnp.float32)
    both += jnp.dot(rows(xp_ref, 2), wc1_ref[2], preferred_element_type=jnp.float32)
    main = bn_relu(both[:, :WCout], g1_ref, b1_ref)      # tile-aligned lane slice
    skip = both[:, WCout:]                               # tile-aligned lane slice

    # H-pad main into the bf16 scratch; zero ONLY the two border rows.
    mpad_ref[:, 0:1, :] = jnp.zeros((N, 1, WCout), jnp.bfloat16)
    mpad_ref[:, Hp - 1:Hp, :] = jnp.zeros((N, 1, WCout), jnp.bfloat16)
    mpad_ref[:, 1:H + 1, :] = main.reshape(N, H, WCout).astype(jnp.bfloat16)

    # conv2 (3x3) via banded matmuls, add skip, BN2 + ReLU, lane-dense store.
    out = skip
    out += jnp.dot(rows(mpad_ref, 0), w2b_ref[0], preferred_element_type=jnp.float32)
    out += jnp.dot(rows(mpad_ref, 1), w2b_ref[1], preferred_element_type=jnp.float32)
    out += jnp.dot(rows(mpad_ref, 2), w2b_ref[2], preferred_element_type=jnp.float32)
    out_ref[...] = bn_relu(out, g2_ref, b2_ref)


# ------------------------- banded weight construction -------------------------- #

def _banded_conv_matrix(w_dy, wd):
    """Band matrix for one vertical tap of a 3x3 'same' conv in packed-lane form.

    w_dy: (3, Ci, Co) taps over dx.  Returns (wd*Ci, wd*Co) with
      M[xi*Ci+ci, x*Co+co] = w_dy[xi-x+1, ci, co]  if 0 <= xi-x+1 <= 2 else 0,
    so horizontal zero-padding is implicit in the band structure."""
    ci, co = w_dy.shape[1], w_dy.shape[2]
    xi = jnp.arange(wd)[:, None]
    x = jnp.arange(wd)[None, :]
    dx = xi - x + 1
    valid = (dx >= 0) & (dx <= 2)
    blocks = jnp.where(valid[:, :, None, None], w_dy[jnp.clip(dx, 0, 2)], 0.0)
    return blocks.transpose(0, 2, 1, 3).reshape(wd * ci, wd * co)


def _skip_band_matrix(w_skip, wd):
    """Band matrix for the 1x1 skip conv: M[x*Ci+ci, x*Co+co] = w_skip[ci, co]."""
    ci, co = w_skip.shape
    eye = jnp.eye(wd, dtype=w_skip.dtype)
    blocks = eye[:, :, None, None] * w_skip[None, None, :, :]
    return blocks.transpose(0, 2, 1, 3).reshape(wd * ci, wd * co)


# -------------------------------- glue / wrapper ------------------------------- #

def spectral_normalize(w):
    """Divide a weight by its largest singular value (the fixed point of PyTorch's
    power iteration). Applied once at parameter-construction time, outside the jit."""
    m = w.reshape(-1, w.shape[-1])
    return w / jnp.linalg.norm(m, ord=2)


def res_block_up(x_nchw, params):
    """ResBlockUp forward. Input/output are NCHW float32 (PyTorch convention)."""
    w_skip, w1, w2 = params["w_skip"], params["w1"], params["w2"]
    g1, b1, g2, b2 = params["g1"], params["b1"], params["g2"], params["b2"]

    N, Cin, H, W = x_nchw.shape
    Cout = w_skip.shape[-1]
    H2, W2 = 2 * H, 2 * W

    # Input prep in XLA: NCHW -> NHWC, x2 nearest upsample, pack (x, cin) into lanes,
    # pad H only (horizontal padding is folded into the band matrices), cast to bf16.
    # TODO(synk): fold the x2 nearest upsample into conv1 as 4 sub-pixel convolutions
    # (pixel-shuffle form) to avoid materializing the 4x repeated tensor at larger shapes.
    x = jnp.transpose(x_nchw, (0, 2, 3, 1))
    x = jnp.repeat(jnp.repeat(x, 2, axis=1), 2, axis=2)
    xp = x.reshape(N, H2, W2 * Cin)
    xp = jnp.pad(xp, ((0, 0), (1, 1), (0, 0))).astype(jnp.bfloat16)

    # Banded (lane-dense) weights: one (W2*Cin, W2*Cout) band per vertical tap dy.
    # The 1x1 skip conv is folded into the dy=1 band as tile-aligned extra columns
    # [W2*Cout : 2*W2*Cout].  (Built once per call; tiny at these W/C.)
    zeros_skip = jnp.zeros((W2 * Cin, W2 * Cout), jnp.float32)
    skipb = _skip_band_matrix(w_skip, W2)
    wc1 = jnp.stack([
        jnp.concatenate([_banded_conv_matrix(w1[0], W2), zeros_skip], axis=1),
        jnp.concatenate([_banded_conv_matrix(w1[1], W2), skipb], axis=1),
        jnp.concatenate([_banded_conv_matrix(w1[2], W2), zeros_skip], axis=1),
    ]).astype(jnp.bfloat16)                                   # (3, W2*Cin, 2*W2*Cout)
    w2b = jnp.stack([_banded_conv_matrix(w2[d], W2) for d in range(3)]
                    ).astype(jnp.bfloat16)                    # (3, W2*Cout, W2*Cout)

    # Lane -> channel selectors for in-kernel BatchNorm stats (channel = lane % Cout).
    sel = (jnp.arange(W2 * Cout)[:, None] % Cout
           == jnp.arange(Cout)[None, :]).astype(jnp.float32)  # (W2*Cout, Cout)
    selt = jnp.transpose(sel)                                 # (Cout, W2*Cout)

    vmem = pl.BlockSpec(memory_space=pltpu.MemorySpace.VMEM)

    # TODO(synk): for larger N/H/W, add a ("parallel", ...) grid over N / H2 row bands
    # (1-row halo, two-pass cross-tile BatchNorm) so v7x's 2 TensorCores are used and the
    # resident footprint stays under v7x's 64 MiB VMEM; also switch the banded weights
    # back to a blocked im2col once Cin/Cout approach 128.
    out2d = pl.pallas_call(
        _res_block_up_kernel,
        out_shape=jax.ShapeDtypeStruct((N * H2, W2 * Cout), jnp.float32),
        in_specs=[vmem] * 9,
        out_specs=vmem,
        scratch_shapes=[pltpu.VMEM((N, H2 + 2, W2 * Cout), jnp.bfloat16)],
    )(xp, wc1, w2b, sel, selt, g1, b1, g2, b2)

    # Unpack the lane-dense slab to NCHW outside the kernel.
    out = out2d.reshape(N, H2, W2, Cout)
    return jnp.transpose(out, (0, 3, 1, 2))


# ------------------------------ pure-JAX reference ------------------------------ #

def _bn_relu_ref(x, g, b):
    mean = jnp.mean(x, axis=(0, 1, 2), keepdims=True)
    var = jnp.mean(jnp.square(x - mean), axis=(0, 1, 2), keepdims=True)
    return jnp.maximum((x - mean) * jax.lax.rsqrt(var + _EPS) * g + b, 0.0)


def res_block_up_reference(x_nchw, params):
    """Reference with the same bf16-operand / f32-accumulate conv arithmetic."""
    dn = ('NHWC', 'HWIO', 'NHWC')

    def conv(a, w):
        return jax.lax.conv_general_dilated(
            a.astype(jnp.bfloat16), w.astype(jnp.bfloat16), (1, 1), 'SAME',
            dimension_numbers=dn, preferred_element_type=jnp.float32)

    x = jnp.transpose(x_nchw, (0, 2, 3, 1))
    x = jnp.repeat(jnp.repeat(x, 2, axis=1), 2, axis=2)
    w_skip = params["w_skip"].reshape(1, 1, *params["w_skip"].shape)
    skip = conv(x, w_skip)
    main = _bn_relu_ref(conv(x, params["w1"]), params["g1"], params["b1"])
    main = conv(main, params["w2"])
    out = _bn_relu_ref(main + skip, params["g2"], params["b2"])
    return jnp.transpose(out, (0, 3, 1, 2))


# ------------------------------------- main ------------------------------------- #

if __name__ == "__main__":
    key = jax.random.PRNGKey(0)
    ks = jax.random.split(key, 8)
    N, Cin, Cout, S = 2, 4, 8, 16

    x = jax.random.normal(ks[0], (N, Cin, S, S), jnp.float32)

    # Deterministic synthetic parameters (shapes per ResBlockUp.__init__).
    params = {
        # skip_conv: Conv2d(Cin, Cout, 1, 1, 0, bias=False) with spectral_norm
        "w_skip": spectral_normalize(0.2 * jax.random.normal(ks[1], (Cin, Cout), jnp.float32)),
        # main_conv1: Conv2d(Cin, Cout, 3, 1, 1, bias=False) with spectral_norm (HWIO)
        "w1": spectral_normalize(0.2 * jax.random.normal(ks[2], (3, 3, Cin, Cout), jnp.float32)),
        # main_conv2: Conv2d(Cout, Cout, 3, 1, 1, bias=False) with spectral_norm (HWIO)
        "w2": spectral_normalize(0.2 * jax.random.normal(ks[3], (3, 3, Cout, Cout), jnp.float32)),
        # BatchNorm2d affine params, stored as (1, C) for lane broadcasting in-kernel
        "g1": 1.0 + 0.1 * jax.random.normal(ks[4], (1, Cout), jnp.float32),
        "b1": 0.1 * jax.random.normal(ks[5], (1, Cout), jnp.float32),
        "g2": 1.0 + 0.1 * jax.random.normal(ks[6], (1, Cout), jnp.float32),
        "b2": 0.1 * jax.random.normal(ks[7], (1, Cout), jnp.float32),
    }

    out = jax.jit(res_block_up)(x, params)
    out = jax.block_until_ready(out)
    assert out.shape == (N, Cout, 2 * S, 2 * S)

    ref = res_block_up_reference(x, params)
    # bf16 MXU operands with f32 accumulation on both sides; 5e-3 covers rounding-order
    # and rsqrt-implementation differences.
    np.testing.assert_allclose(np.asarray(out), np.asarray(ref), atol=5e-3, rtol=5e-3)

    print("KERNEL_OK")
</pallas_src>

<mosaic_0001>
module attributes {stable_mosaic.version = 11 : i64} {
  func.func @_res_block_up_kernel(%arg0: memref<2x34x128xbf16, #tpu.memory_space<vmem>>, %arg1: memref<3x128x512xbf16, #tpu.memory_space<vmem>>, %arg2: memref<3x256x256xbf16, #tpu.memory_space<vmem>>, %arg3: memref<256x8xf32, #tpu.memory_space<vmem>>, %arg4: memref<8x256xf32, #tpu.memory_space<vmem>>, %arg5: memref<1x8xf32, #tpu.memory_space<vmem>>, %arg6: memref<1x8xf32, #tpu.memory_space<vmem>>, %arg7: memref<1x8xf32, #tpu.memory_space<vmem>>, %arg8: memref<1x8xf32, #tpu.memory_space<vmem>>, %arg9: memref<64x256xf32, #tpu.memory_space<vmem>>, %arg10: memref<2x34x256xbf16, #tpu.memory_space<vmem>>) attributes {dimension_semantics = [], scalar_prefetch = 0 : i64, scratch_operands = 1 : i64, tpu.core_type = #tpu.core_type<tc>} {
    %c0 = arith.constant 0 : index
    %c0_0 = arith.constant 0 : index
    %c0_1 = arith.constant 0 : index
    %0 = vector.load %arg0[%c0, %c0_0, %c0_1] : memref<2x34x128xbf16, #tpu.memory_space<vmem>>, vector<2x32x128xbf16>
    %1 = vector.shape_cast %0 : vector<2x32x128xbf16> to vector<64x128xbf16>
    %c0_2 = arith.constant 0 : index
    %c0_3 = arith.constant 0 : index
    %c0_4 = arith.constant 0 : index
    %2 = vector.load %arg1[%c0_2, %c0_3, %c0_4] : memref<3x128x512xbf16, #tpu.memory_space<vmem>>, vector<1x128x512xbf16>
    %3 = vector.shape_cast %2 : vector<1x128x512xbf16> to vector<128x512xbf16>
    %cst = arith.constant dense<0.000000e+00> : vector<64x512xf32>
    %4 = tpu.matmul %1, %3, %cst {dimension_numbers = #tpu.dot_dimension_numbers<[1], [0], [0], [1], [0, 0, 1, 1], [], []>} : vector<64x128xbf16>, vector<128x512xbf16>, vector<64x512xf32> -> vector<64x512xf32>
    %c0_5 = arith.constant 0 : index
    %c1 = arith.constant 1 : index
    %c0_6 = arith.constant 0 : index
    %5 = vector.load %arg0[%c0_5, %c1, %c0_6] : memref<2x34x128xbf16, #tpu.memory_space<vmem>>, vector<2x32x128xbf16>
    %6 = vector.shape_cast %5 : vector<2x32x128xbf16> to vector<64x128xbf16>
    %c1_7 = arith.constant 1 : index
    %c0_8 = arith.constant 0 : index
    %c0_9 = arith.constant 0 : index
    %7 = vector.load %arg1[%c1_7, %c0_8, %c0_9] : memref<3x128x512xbf16, #tpu.memory_space<vmem>>, vector<1x128x512xbf16>
    %8 = vector.shape_cast %7 : vector<1x128x512xbf16> to vector<128x512xbf16>
    %cst_10 = arith.constant dense<0.000000e+00> : vector<64x512xf32>
    %9 = tpu.matmul %6, %8, %cst_10 {dimension_numbers = #tpu.dot_dimension_numbers<[1], [0], [0], [1], [0, 0, 1, 1], [], []>} : vector<64x128xbf16>, vector<128x512xbf16>, vector<64x512xf32> -> vector<64x512xf32>
    %10 = arith.addf %4, %9 : vector<64x512xf32>
    %c0_11 = arith.constant 0 : index
    %c2 = arith.constant 2 : index
    %c0_12 = arith.constant 0 : index
    %11 = vector.load %arg0[%c0_11, %c2, %c0_12] : memref<2x34x128xbf16, #tpu.memory_space<vmem>>, vector<2x32x128xbf16>
    %12 = vector.shape_cast %11 : vector<2x32x128xbf16> to vector<64x128xbf16>
    %c2_13 = arith.constant 2 : index
    %c0_14 = arith.constant 0 : index
    %c0_15 = arith.constant 0 : index
    %13 = vector.load %arg1[%c2_13, %c0_14, %c0_15] : memref<3x128x512xbf16, #tpu.memory_space<vmem>>, vector<1x128x512xbf16>
    %14 = vector.shape_cast %13 : vector<1x128x512xbf16> to vector<128x512xbf16>
    %cst_16 = arith.constant dense<0.000000e+00> : vector<64x512xf32>
    %15 = tpu.matmul %12, %14, %cst_16 {dimension_numbers = #tpu.dot_dimension_numbers<[1], [0], [0], [1], [0, 0, 1, 1], [], []>} : vector<64x128xbf16>, vector<128x512xbf16>, vector<64x512xf32> -> vector<64x512xf32>
    %16 = arith.addf %10, %15 : vector<64x512xf32>
    %17 = vector.extract_strided_slice %16 {offsets = [0, 0], sizes = [64, 256], strides = [1, 1]} : vector<64x512xf32> to vector<64x256xf32>
    %cst_17 = arith.constant dense<0.000000e+00> : vector<256xf32>
    %18 = vector.multi_reduction <add>, %17, %cst_17 [0] : vector<64x256xf32> to vector<256xf32>
    %19 = vector.shape_cast %18 : vector<256xf32> to vector<1x256xf32>
    %20 = arith.mulf %17, %17 : vector<64x256xf32>
    %cst_18 = arith.constant dense<0.000000e+00> : vector<256xf32>
    %21 = vector.multi_reduction <add>, %20, %cst_18 [0] : vector<64x256xf32> to vector<256xf32>
    %22 = vector.shape_cast %21 : vector<256xf32> to vector<1x256xf32>
    %23 = tpu.concatenate %19, %22 in 0 : vector<1x256xf32>, vector<1x256xf32> -> vector<2x256xf32>
    %c0_19 = arith.constant 0 : index
    %c0_20 = arith.constant 0 : index
    %24 = vector.load %arg3[%c0_19, %c0_20] : memref<256x8xf32, #tpu.memory_space<vmem>>, vector<256x8xf32>
    %cst_21 = arith.constant dense<0.000000e+00> : vector<2x8xf32>
    %25 = tpu.matmul %23, %24, %cst_21 {dimension_numbers = #tpu.dot_dimension_numbers<[1], [0], [0], [1], [0, 0, 1, 1], [], []>} : vector<2x256xf32>, vector<256x8xf32>, vector<2x8xf32> -> vector<2x8xf32>
    %cst_22 = arith.constant 4.8828125E-4 : f32
    %26 = vector.broadcast %cst_22 : f32 to vector<2x8xf32>
    %27 = arith.mulf %25, %26 : vector<2x8xf32>
    %28 = vector.extract_strided_slice %27 {offsets = [0, 0], sizes = [1, 8], strides = [1, 1]} : vector<2x8xf32> to vector<1x8xf32>
    %29 = vector.extract_strided_slice %27 {offsets = [1, 0], sizes = [1, 8], strides = [1, 1]} : vector<2x8xf32> to vector<1x8xf32>
    %30 = arith.mulf %28, %28 : vector<1x8xf32>
    %31 = arith.subf %29, %30 : vector<1x8xf32>
    %cst_23 = arith.constant 0.000000e+00 : f32
    %32 = vector.broadcast %cst_23 : f32 to vector<1x8xf32>
    %33 = arith.maximumf %31, %32 : vector<1x8xf32>
    %c0_24 = arith.constant 0 : index
    %c0_25 = arith.constant 0 : index
    %34 = vector.load %arg5[%c0_24, %c0_25] : memref<1x8xf32, #tpu.memory_space<vmem>>, vector<1x8xf32>
    %cst_26 = arith.constant 9.99999974E-6 : f32
    %35 = vector.broadcast %cst_26 : f32 to vector<1x8xf32>
    %36 = arith.addf %33, %35 : vector<1x8xf32>
    %37 = math.rsqrt %36 : vector<1x8xf32>
    %38 = arith.mulf %34, %37 : vector<1x8xf32>
    %c0_27 = arith.constant 0 : index
    %c0_28 = arith.constant 0 : index
    %39 = vector.load %arg6[%c0_27, %c0_28] : memref<1x8xf32, #tpu.memory_space<vmem>>, vector<1x8xf32>
    %40 = arith.mulf %28, %38 : vector<1x8xf32>
    %41 = arith.subf %39, %40 : vector<1x8xf32>
    %42 = tpu.concatenate %38, %41 in 0 : vector<1x8xf32>, vector<1x8xf32> -> vector<2x8xf32>
    %c0_29 = arith.constant 0 : index
    %c0_30 = arith.constant 0 : index
    %43 = vector.load %arg4[%c0_29, %c0_30] : memref<8x256xf32, #tpu.memory_space<vmem>>, vector<8x256xf32>
    %cst_31 = arith.constant dense<0.000000e+00> : vector<2x256xf32>
    %44 = tpu.matmul %42, %43, %cst_31 {dimension_numbers = #tpu.dot_dimension_numbers<[1], [0], [0], [1], [0, 0, 1, 1], [], []>} : vector<2x8xf32>, vector<8x256xf32>, vector<2x256xf32> -> vector<2x256xf32>
    %45 = vector.extract_strided_slice %44 {offsets = [0, 0], sizes = [1, 256], strides = [1, 1]} : vector<2x256xf32> to vector<1x256xf32>
    %46 = vector.broadcast %45 : vector<1x256xf32> to vector<64x256xf32>
    %47 = arith.mulf %17, %46 : vector<64x256xf32>
    %48 = vector.extract_strided_slice %44 {offsets = [1, 0], sizes = [1, 256], strides = [1, 1]} : vector<2x256xf32> to vector<1x256xf32>
    %49 = vector.broadcast %48 : vector<1x256xf32> to vector<64x256xf32>
    %50 = arith.addf %47, %49 : vector<64x256xf32>
    %cst_32 = arith.constant 0.000000e+00 : f32
    %51 = vector.broadcast %cst_32 : f32 to vector<64x256xf32>
    %52 = arith.maximumf %50, %51 : vector<64x256xf32>
    %53 = vector.extract_strided_slice %16 {offsets = [0, 256], sizes = [64, 256], strides = [1, 1]} : vector<64x512xf32> to vector<64x256xf32>
    %cst_33 = arith.constant 0.000000e+00 : bf16
    %54 = vector.broadcast %cst_33 : bf16 to vector<2x1x256xbf16>
    %c0_34 = arith.constant 0 : index
    %c0_35 = arith.constant 0 : index
    %c0_36 = arith.constant 0 : index
    %55 = vector.load %arg10[%c0_34, %c0_35, %c0_36] : memref<2x34x256xbf16, #tpu.memory_space<vmem>>, vector<2x1x256xbf16>
    tpu.vector_store %arg10[%c0_34, %c0_35, %c0_36], %54 {strides = array<i32>} : memref<2x34x256xbf16, #tpu.memory_space<vmem>>, vector<2x1x256xbf16>,
    %cst_37 = arith.constant 0.000000e+00 : bf16
    %56 = vector.broadcast %cst_37 : bf16 to vector<2x1x256xbf16>
    %c0_38 = arith.constant 0 : index
    %c33 = arith.constant 33 : index
    %c0_39 = arith.constant 0 : index
    %57 = vector.load %arg10[%c0_38, %c33, %c0_39] : memref<2x34x256xbf16, #tpu.memory_space<vmem>>, vector<2x1x256xbf16>
    tpu.vector_store %arg10[%c0_38, %c33, %c0_39], %56 {strides = array<i32>} : memref<2x34x256xbf16, #tpu.memory_space<vmem>>, vector<2x1x256xbf16>,
    %58 = vector.shape_cast %52 : vector<64x256xf32> to vector<2x32x256xf32>
    %59 = arith.truncf %58 : vector<2x32x256xf32> to vector<2x32x256xbf16>
    %c0_40 = arith.constant 0 : index
    %c1_41 = arith.constant 1 : index
    %c0_42 = arith.constant 0 : index
    %60 = vector.load %arg10[%c0_40, %c1_41, %c0_42] : memref<2x34x256xbf16, #tpu.memory_space<vmem>>, vector<2x32x256xbf16>
    tpu.vector_store %arg10[%c0_40, %c1_41, %c0_42], %59 {strides = array<i32>} : memref<2x34x256xbf16, #tpu.memory_space<vmem>>, vector<2x32x256xbf16>,
    %c0_43 = arith.constant 0 : index
    %c0_44 = arith.constant 0 : index
    %c0_45 = arith.constant 0 : index
    %61 = vector.load %arg10[%c0_43, %c0_44, %c0_45] : memref<2x34x256xbf16, #tpu.memory_space<vmem>>, vector<2x32x256xbf16>
    %62 = vector.shape_cast %61 : vector<2x32x256xbf16> to vector<64x256xbf16>
    %c0_46 = arith.constant 0 : index
    %c0_47 = arith.constant 0 : index
    %c0_48 = arith.constant 0 : index
    %63 = vector.load %arg2[%c0_46, %c0_47, %c0_48] : memref<3x256x256xbf16, #tpu.memory_space<vmem>>, vector<1x256x256xbf16>
    %64 = vector.shape_cast %63 : vector<1x256x256xbf16> to vector<256x256xbf16>
    %cst_49 = arith.constant dense<0.000000e+00> : vector<64x256xf32>
    %65 = tpu.matmul %62, %64, %cst_49 {dimension_numbers = #tpu.dot_dimension_numbers<[1], [0], [0], [1], [0, 0, 1, 1], [], []>} : vector<64x256xbf16>, vector<256x256xbf16>, vector<64x256xf32> -> vector<64x256xf32>
    %66 = arith.addf %53, %65 : vector<64x256xf32>
    %c0_50 = arith.constant 0 : index
    %c1_51 = arith.constant 1 : index
    %c0_52 = arith.constant 0 : index
    %67 = vector.load %arg10[%c0_50, %c1_51, %c0_52] : memref<2x34x256xbf16, #tpu.memory_space<vmem>>, vector<2x32x256xbf16>
    %68 = vector.shape_cast %67 : vector<2x32x256xbf16> to vector<64x256xbf16>
    %c1_53 = arith.constant 1 : index
    %c0_54 = arith.constant 0 : index
    %c0_55 = arith.constant 0 : index
    %69 = vector.load %arg2[%c1_53, %c0_54, %c0_55] : memref<3x256x256xbf16, #tpu.memory_space<vmem>>, vector<1x256x256xbf16>
    %70 = vector.shape_cast %69 : vector<1x256x256xbf16> to vector<256x256xbf16>
    %cst_56 = arith.constant dense<0.000000e+00> : vector<64x256xf32>
    %71 = tpu.matmul %68, %70, %cst_56 {dimension_numbers = #tpu.dot_dimension_numbers<[1], [0], [0], [1], [0, 0, 1, 1], [], []>} : vector<64x256xbf16>, vector<256x256xbf16>, vector<64x256xf32> -> vector<64x256xf32>
    %72 = arith.addf %66, %71 : vector<64x256xf32>
    %c0_57 = arith.constant 0 : index
    %c2_58 = arith.constant 2 : index
    %c0_59 = arith.constant 0 : index
    %73 = vector.load %arg10[%c0_57, %c2_58, %c0_59] : memref<2x34x256xbf16, #tpu.memory_space<vmem>>, vector<2x32x256xbf16>
    %74 = vector.shape_cast %73 : vector<2x32x256xbf16> to vector<64x256xbf16>
    %c2_60 = arith.constant 2 : index
    %c0_61 = arith.constant 0 : index
    %c0_62 = arith.constant 0 : index
    %75 = vector.load %arg2[%c2_60, %c0_61, %c0_62] : memref<3x256x256xbf16, #tpu.memory_space<vmem>>, vector<1x256x256xbf16>
    %76 = vector.shape_cast %75 : vector<1x256x256xbf16> to vector<256x256xbf16>
    %cst_63 = arith.constant dense<0.000000e+00> : vector<64x256xf32>
    %77 = tpu.matmul %74, %76, %cst_63 {dimension_numbers = #tpu.dot_dimension_numbers<[1], [0], [0], [1], [0, 0, 1, 1], [], []>} : vector<64x256xbf16>, vector<256x256xbf16>, vector<64x256xf32> -> vector<64x256xf32>
    %78 = arith.addf %72, %77 : vector<64x256xf32>
    %cst_64 = arith.constant dense<0.000000e+00> : vector<256xf32>
    %79 = vector.multi_reduction <add>, %78, %cst_64 [0] : vector<64x256xf32> to vector<256xf32>
    %80 = vector.shape_cast %79 : vector<256xf32> to vector<1x256xf32>
    %81 = arith.mulf %78, %78 : vector<64x256xf32>
    %cst_65 = arith.constant dense<0.000000e+00> : vector<256xf32>
    %82 = vector.multi_reduction <add>, %81, %cst_65 [0] : vector<64x256xf32> to vector<256xf32>
    %83 = vector.shape_cast %82 : vector<256xf32> to vector<1x256xf32>
    %84 = tpu.concatenate %80, %83 in 0 : vector<1x256xf32>, vector<1x256xf32> -> vector<2x256xf32>
    %c0_66 = arith.constant 0 : index
    %c0_67 = arith.constant 0 : index
    %85 = vector.load %arg3[%c0_66, %c0_67] : memref<256x8xf32, #tpu.memory_space<vmem>>, vector<256x8xf32>
    %cst_68 = arith.constant dense<0.000000e+00> : vector<2x8xf32>
    %86 = tpu.matmul %84, %85, %cst_68 {dimension_numbers = #tpu.dot_dimension_numbers<[1], [0], [0], [1], [0, 0, 1, 1], [], []>} : vector<2x256xf32>, vector<256x8xf32>, vector<2x8xf32> -> vector<2x8xf32>
    %cst_69 = arith.constant 4.8828125E-4 : f32
    %87 = vector.broadcast %cst_69 : f32 to vector<2x8xf32>
    %88 = arith.mulf %86, %87 : vector<2x8xf32>
    %89 = vector.extract_strided_slice %88 {offsets = [0, 0], sizes = [1, 8], strides = [1, 1]} : vector<2x8xf32> to vector<1x8xf32>
    %90 = vector.extract_strided_slice %88 {offsets = [1, 0], sizes = [1, 8], strides = [1, 1]} : vector<2x8xf32> to vector<1x8xf32>
    %91 = arith.mulf %89, %89 : vector<1x8xf32>
    %92 = arith.subf %90, %91 : vector<1x8xf32>
    %cst_70 = arith.constant 0.000000e+00 : f32
    %93 = vector.broadcast %cst_70 : f32 to vector<1x8xf32>
    %94 = arith.maximumf %92, %93 : vector<1x8xf32>
    %c0_71 = arith.constant 0 : index
    %c0_72 = arith.constant 0 : index
    %95 = vector.load %arg7[%c0_71, %c0_72] : memref<1x8xf32, #tpu.memory_space<vmem>>, vector<1x8xf32>
    %cst_73 = arith.constant 9.99999974E-6 : f32
    %96 = vector.broadcast %cst_73 : f32 to vector<1x8xf32>
    %97 = arith.addf %94, %96 : vector<1x8xf32>
    %98 = math.rsqrt %97 : vector<1x8xf32>
    %99 = arith.mulf %95, %98 : vector<1x8xf32>
    %c0_74 = arith.constant 0 : index
    %c0_75 = arith.constant 0 : index
    %100 = vector.load %arg8[%c0_74, %c0_75] : memref<1x8xf32, #tpu.memory_space<vmem>>, vector<1x8xf32>
    %101 = arith.mulf %89, %99 : vector<1x8xf32>
    %102 = arith.subf %100, %101 : vector<1x8xf32>
    %103 = tpu.concatenate %99, %102 in 0 : vector<1x8xf32>, vector<1x8xf32> -> vector<2x8xf32>
    %c0_76 = arith.constant 0 : index
    %c0_77 = arith.constant 0 : index
    %104 = vector.load %arg4[%c0_76, %c0_77] : memref<8x256xf32, #tpu.memory_space<vmem>>, vector<8x256xf32>
    %cst_78 = arith.constant dense<0.000000e+00> : vector<2x256xf32>
    %105 = tpu.matmul %103, %104, %cst_78 {dimension_numbers = #tpu.dot_dimension_numbers<[1], [0], [0], [1], [0, 0, 1, 1], [], []>} : vector<2x8xf32>, vector<8x256xf32>, vector<2x256xf32> -> vector<2x256xf32>
    %106 = vector.extract_strided_slice %105 {offsets = [0, 0], sizes = [1, 256], strides = [1, 1]} : vector<2x256xf32> to vector<1x256xf32>
    %107 = vector.broadcast %106 : vector<1x256xf32> to vector<64x256xf32>
    %108 = arith.mulf %78, %107 : vector<64x256xf32>
    %109 = vector.extract_strided_slice %105 {offsets = [1, 0], sizes = [1, 256], strides = [1, 1]} : vector<2x256xf32> to vector<1x256xf32>
    %110 = vector.broadcast %109 : vector<1x256xf32> to vector<64x256xf32>
    %111 = arith.addf %108, %110 : vector<64x256xf32>
    %cst_79 = arith.constant 0.000000e+00 : f32
    %112 = vector.broadcast %cst_79 : f32 to vector<64x256xf32>
    %113 = arith.maximumf %111, %112 : vector<64x256xf32>
    %c0_80 = arith.constant 0 : index
    %c0_81 = arith.constant 0 : index
    %114 = vector.load %arg9[%c0_80, %c0_81] : memref<64x256xf32, #tpu.memory_space<vmem>>, vector<64x256xf32>
    tpu.vector_store %arg9[%c0_80, %c0_81], %113 {strides = array<i32>} : memref<64x256xf32, #tpu.memory_space<vmem>>, vector<64x256xf32>,
    return
  }
}

</mosaic_0001>

<bundles_post_ra>
// kernel: res_block_up.1
= control target key start
LH: loop header
LB: loop body
LE: loop exit
PB: predicated region body
PF: predicated region fallthrough
CT: control target
= control target key end

     0   :  { %v4004_v1 = vmov 0   ;;  %vm75_vm0 = vsmask.f32 3328  ;;  %vm76_vm1 = vsmask.f32 7440  ;;  %v5697_v44 = vmov 0  ;;  %s5676_s1 = inlined_call_operand.vmem [shape: bf16[3,128,512], index: 1, kind: input, shape index: {}]   ;;  %s5677_s0 = inlined_call_operand.vmem [shape: bf16[2,34,128], index: 0, kind: input, shape index: {}]   ;;  %s5678_s3 = inlined_call_operand.vmem [shape: f32[256,8], index: 3, kind: input, shape index: {}]   ;;  %s5679_s4 = inlined_call_operand.vmem [shape: f32[8,256], index: 4, kind: input, shape index: {}]   ;;  %s5680_s2 = inlined_call_operand.vmem [shape: bf16[3,256,256], index: 2, kind: input, shape index: {}]   ;;  %s5681_s5 = inlined_call_operand.vmem [shape: f32[1,8], index: 5, kind: input, shape index: {}]   ;;  %s5682_s6 = inlined_call_operand.vmem [shape: f32[1,8], index: 6, kind: input, shape index: {}]   ;;  %s5683_s7 = inlined_call_operand.vmem [shape: f32[1,8], index: 7, kind: input, shape index: {}]   ;;  %s5684_s8 = inlined_call_operand.vmem [shape: f32[1,8], index: 8, kind: input, shape index: {}]   ;;  %s5685_s9 = inlined_call_operand.vmem [shape: f32[64,256], index: 9, kind: output, shape index: {}]  }
   0x1   :  { %v3708_v0 = vld [vmem:[%s5676_s1 + $0x1e4] ss:$16 sps:$4 sm:$0xff]   ;;  %407 = vmatprep.mubr.bf16.mxu0 %v4004_v1  ;;  %480 = vmatprep.mubr.bf16.mxu1 %v4004_v1  ;;  %v3710_v2 = vld [vmem:[%s5676_s1 + $0x1e0] ss:$16 sps:$4 sm:$0xff]   ;;  %v4109_v18 = vld [vmem:[%s5677_s0 + $0x8] sm:$0xf] }
   0x2   :  { %375 = vmatprep.subr.bf16.mxu0 %v3708_v0  ;;  %v3711_v3 = vld [vmem:[%s5676_s1 + $0x1c4] ss:$16 sps:$4 sm:$0xff]   ;;  %v3713_v4 = vld [vmem:[%s5676_s1 + $0x1c0] ss:$16 sps:$4 sm:$0xff]   ;;  %v4114_v23 = vld [vmem:[%s5677_s0 + $0xc] sm:$0xf] }
   0x3   :  { %376 = vmatpush1.bf16.msra.mxu0 %v3710_v2  ;;  %v3714_v5 = vld [vmem:[%s5676_s1 + $0x1a4] ss:$16 sps:$4 sm:$0xff]   ;;  %v3716_v6 = vld [vmem:[%s5676_s1 + $0x1a0] ss:$16 sps:$4 sm:$0xff]   ;;  %v102_v24 = vshrl.u32 %v4109_v18, 16  ;;  %v108_v25 = vshll.u32 %v4114_v23, 16  ;;  %vm4151_vm2 = vmor %vm75_vm0, %vm76_vm1 }
   0x4   :  { %377 = vmatprep.subr.bf16.mxu0 %v3711_v3  ;;  %v3717_v7 = vld [vmem:[%s5676_s1 + $0x184] ss:$16 sps:$4 sm:$0xff]   ;;  %v3719_v8 = vld [vmem:[%s5676_s1 + $0x180] ss:$16 sps:$4 sm:$0xff]   ;;  %v112_v26 = vshrl.u32 %v4114_v23, 16  ;;  %v98_v27 = vshll.u32 %v4109_v18, 16 }
   0x5   :  { %v4086_v9 = vld [vmem:[%s5677_s0] sm:$0xf]  ;;  %v3720_v10 = vld [vmem:[%s5676_s1 + $0x164] ss:$16 sps:$4 sm:$0xff]   ;;  %v4129_v32 = vld [vmem:[%s5677_s0 + $0x10] sm:$0x1] }
   0x6   :  { %v4094_v11 = vld [vmem:[%s5677_s0 + $0x4] sm:$0xf]  ;;  %v79_v12 = vshrl.u32 %v4086_v9, 16  ;;  %v82_v13 = vshll.u32 %v4086_v9, 16  ;;  %v3722_v16 = vld [vmem:[%s5676_s1 + $0x160] ss:$16 sps:$4 sm:$0xff]  }
   0x7   :  { %378 = vmatpush1.bf16.msra.mxu0 %v3713_v4  ;;  %v88_v14 = vshll.u32 %v4094_v11, 16  ;;  %v92_v15 = vshrl.u32 %v4094_v11, 16  ;;  %v3723_v17 = vld [vmem:[%s5676_s1 + $0x144] ss:$16 sps:$4 sm:$0xff]   ;;  %v3725_v28 = vld [vmem:[%s5676_s1 + $0x140] ss:$16 sps:$4 sm:$0xff]  }
   0x8   :  { %379 = vmatprep.subr.bf16.mxu0 %v3714_v5  ;;  %v81_v19 = vrot.slane %v79_v12, 4  ;;  %v84_v20 = vrot.slane %v82_v13, 5  ;;  %v3726_v29 = vld [vmem:[%s5676_s1 + $0x124] ss:$16 sps:$4 sm:$0xff]   ;;  %v104_v33 = vrot.slane %v102_v24, 4  ;;  %v4131_v34 = vrot.slane %v108_v25, 5 }
   0x9   :  { %v90_v21 = vrot.slane %v88_v14, 5  ;;  %v94_v22 = vrot.slane %v92_v15, 4  ;;  %v114_v35 = vrot.slane %v112_v26, 4  ;;  %v4136_v36 = vld [vmem:[%s5677_s0 + $0x14] sm:$0xf]  ;;  %v100_v37 = vrot.slane %v98_v27, 5 }
   0xa   :  { %v85_v30 = vor.u32 %v84_v20, %v81_v19  ;;  %v4141_v38 = vld [vmem:[%s5677_s0 + $0x18] sm:$0xf]  ;;  %v3728_v39 = vld [vmem:[%s5676_s1 + $0x120] ss:$16 sps:$4 sm:$0xff]   ;;  %v118_v42 = vshll.u32 %v4129_v32, 16  ;;  %v5698_v44 = vsel %vm4151_vm2, 4294967295, %v5697_v44 }
   0xb   :  { %380 = vmatpush1.bf16.msra.mxu0 %v3716_v6  ;;  %v95_v31 = vor.u32 %v94_v22, %v90_v21  ;;  %v3729_v43 = vld [vmem:[%s5676_s1 + $0x104] ss:$16 sps:$4 sm:$0xff]   ;;  %5699 = vst [vmem:[#allocation3_spill] sm:$0xff] %v5698_v44  ;;  %v105_v45 = vor.u32 %v104_v33, %v100_v37  ;;  %v115_v46 = vor.u32 %v114_v35, %v4131_v34  ;;  %v123_v47 = vshrl.u32 %v4136_v36, 16  ;;  %v3731_v51 = vld [vmem:[%s5676_s1 + $0x100] ss:$16 sps:$4 sm:$0xff]  }
   0xc   :  { %381 = vmatprep.subr.bf16.mxu0 %v3717_v7  ;;  %v86_v40 = vrot.slane %v85_v30, 4  ;;  %v126_v48 = vshll.u32 %v4136_v36, 16  ;;  %v132_v49 = vshll.u32 %v4141_v38, 16  ;;  %v136_v50 = vshrl.u32 %v4141_v38, 16  ;;  %v3734_v52 = vld [vmem:[%s5676_s1 + $0xe4] ss:$16 sps:$4 sm:$0xff]  }
   0xd   :  { %v96_v41 = vrot.slane %v95_v31, 4  ;;  %v4169_v53 = vld [vmem:[%s5677_s0 + $0x1c] sm:$0xf]  ;;  %v120_v56 = vrot.slane %v118_v42, 5  ;;  %v106_v57 = vrot.slane %v105_v45, 4  ;;  %v116_v58 = vrot.slane %v115_v46, 4 }
   0xe   :  { %v91_v54 = vsel %vm4151_vm2, %v86_v40, %v90_v21  ;;  %v125_v59 = vrot.slane %v123_v47, 4  ;;  %v128_v60 = vrot.slane %v126_v48, 5  ;;  %v4175_v61 = vrot.slane %v132_v49, 5  ;;  %v4183_v2 = vld [vmem:[%s5677_s0 + $0x20] sm:$0xf] }
   0xf   :  { %382 = vmatpush1.bf16.msra.mxu0 %v3719_v8  ;;  %v101_v55 = vsel %vm4151_vm2, %v96_v41, %v100_v37  ;;  %v138_v62 = vrot.slane %v136_v50, 4  ;;  %vm857_vm3 = vcmask 1042432   ;;  %vm858_vm4 = vcmask 1046532   ;;  %v3732_v4 = vld [vmem:[%s5676_s1 + $0xe0] ss:$16 sps:$4 sm:$0xff]  }
  0x10   :  { %383 = vmatprep.subr.bf16.mxu0 %v3720_v10  ;;  %v4177_v63 = vcombine.low %v91_v54, %v101_v55  ;;  %v142_v0 = vshll.u32 %v4169_v53, 16  ;;  %v862_v3 = vrot.slane %v4094_v11, 5  ;;  %v865_v5 = vrot.slane %v4109_v18, 5  ;;  %v3737_v7 = vld [vmem:[%s5676_s1 + $0xc4] ss:$16 sps:$4 sm:$0xff]   ;;  %vm4202_vm5 = vmor %vm857_vm3, %vm858_vm4 }
  0x11   :  { %v868_v6 = vrot.slane %v4114_v23, 5  ;;  %v111_v8 = vsel %vm4151_vm2, %v106_v57, %v4131_v34  ;;  %v121_v10 = vsel %vm4151_vm2, %v116_v58, %v120_v56  ;;  %v129_v12 = vor.u32 %v128_v60, %v125_v59  ;;  %v3735_v24 = vld [vmem:[%s5676_s1 + $0xc0] ss:$16 sps:$4 sm:$0xff]   ;;  %v3743_v41 = vld [vmem:[%s5676_s1 + $0x84] ss:$16 sps:$4 sm:$0xff]  }
  0x12   :  { %v146_v13 = vshrl.u32 %v4169_v53, 16  ;;  %v5700_v14 = vmov 0  ;;  %v139_v15 = vor.u32 %v138_v62, %v4175_v61  ;;  %v4209_v19 = vrot.slane %v142_v0, 5  ;;  %v3738_v35 = vld [vmem:[%s5676_s1 + $0xa0] ss:$16 sps:$4 sm:$0xff]  }
  0x13   :  { %384 = vmatpush1.bf16.msra.mxu0 %v3722_v16  ;;  %v5701_v14 = vsel %vm4202_vm5, 4294967295, %v5700_v14  ;;  %v152_v16 = vshll.u32 %v4183_v2, 16  ;;  %v156_v20 = vshrl.u32 %v4183_v2, 16  ;;  %v867_v21 = vrot.slane %v865_v5, 4  ;;  %v74_v47 = vld [vmem:[%s5677_s0 + $0x24] sm:$0x1] }
  0x14   :  { %385 = vmatprep.subr.bf16.mxu0 %v3723_v17  ;;  %5702 = vst [vmem:[#allocation4_spill] sm:$0xff] %v5701_v14  ;;  %v864_v17 = vrot.slane %v862_v3, 4  ;;  %v870_v22 = vrot.slane %v868_v6, 4  ;;  %v4216_v25 = vcombine.low %v111_v8, %v121_v10  ;;  %v871_v27 = vrot.slane %v4129_v32, 5  ;;  %v851_v48 = vld [vmem:[%s5677_s0] sm:$0xe] }
  0x15   :  { %v130_v30 = vrot.slane %v129_v12, 4  ;;  %v148_v31 = vrot.slane %v146_v13, 4  ;;  %v869_v33 = vsel %vm4202_vm5, %v867_v21, %v868_v6  ;;  %v878_v34 = vrot.slane %v4169_v53, 5  ;;  %v852_v49 = vld [vmem:[%s5677_s0 + $0x14] sm:$0xe] }
  0x16   :  { %v866_v26 = vsel %vm4202_vm5, %v864_v17, %v865_v5  ;;  %v140_v37 = vrot.slane %v139_v15, 4  ;;  %v4231_v32 = vrot.slane %v152_v16, 5  ;;  %v158_v42 = vrot.slane %v156_v20, 4  ;;  %v3784_v59 = vld [vmem:[%s5676_s1 + $0x1ec] ss:$16 sps:$4 sm:$0xff]  }
  0x17   :  { %386 = vmatpush1.bf16.msra.mxu0 %v3725_v28  ;;  %v875_v28 = vrot.slane %v4141_v38, 5  ;;  %v880_v45 = vrot.slane %v878_v34, 4  ;;  %v881_v46 = vrot.slane %v4183_v2, 5  ;;  %v135_v56 = vsel %vm4151_vm2, %v130_v30, %v4175_v61  ;;  %v3786_v60 = vld [vmem:[%s5676_s1 + $0x1e8] ss:$16 sps:$4 sm:$0xff]   ;;  %448 = vmatprep.subr.bf16.mxu1 %v3784_v59 }
  0x18   :  { %387 = vmatprep.subr.bf16.mxu0 %v3726_v29  ;;  %v3740_v29 = vld [vmem:[%s5676_s1 + $0xa4] ss:$16 sps:$4 sm:$0xff]   ;;  %v149_v57 = vor.u32 %v148_v31, %v4209_v19  ;;  %v884_v58 = vrot.slane %v74_v47, 5  ;;  %v145_v62 = vsel %vm4151_vm2, %v140_v37, %v4209_v19  ;;  %v159_v0 = vor.u32 %v158_v42, %v4231_v32  ;;  %v3787_v5 = vld [vmem:[%s5676_s1 + $0x1cc] ss:$16 sps:$4 sm:$0xff]   ;;  %449 = vmatpush1.bf16.msra.mxu1 %v3786_v60 }
  0x19   :  { %v877_v40 = vrot.slane %v875_v28, 4  ;;  %v882_v54 = vsel %vm4202_vm5, %v880_v45, %v881_v46  ;;  %v883_v55 = vrot.slane %v881_v46, 4  ;;  %v3741_v6 = vld [vmem:[%s5676_s1 + $0x80] ss:$16 sps:$4 sm:$0xff]   ;;  %v3746_v12 = vld [vmem:[%s5676_s1 + $0x64] ss:$16 sps:$4 sm:$0xff]   ;;  %v4294_v16 = vcombine.low %v135_v56, %v145_v62  ;;  %450 = vmatprep.subr.bf16.mxu1 %v3787_v5 }
  0x1a   :  { %v3789_v15 = vld [vmem:[%s5676_s1 + $0x1c8] ss:$16 sps:$4 sm:$0xff]   ;;  %v3790_v17 = vld [vmem:[%s5676_s1 + $0x1ac] ss:$16 sps:$4 sm:$0xff]   ;;  %v3744_v19 = vld [vmem:[%s5676_s1 + $0x60] ss:$16 sps:$4 sm:$0xff]   ;;  %v4357_v46 = vcombine.low %v4086_v9, %v4094_v11  ;;  %v4419_v62 = vcombine.low %v4136_v36, %v4141_v38 }
  0x1b   :  { %388 = vmatpush1.bf16.msra.mxu0 %v3728_v39  ;;  %v872_v39 = vsel %vm4202_vm5, %v870_v22, %v871_v27  ;;  %v879_v50 = vsel %vm4202_vm5, %v877_v40, %v878_v34  ;;  %v150_v20 = vrot.slane %v149_v57, 4  ;;  %v160_v21 = vrot.slane %v159_v0, 4  ;;  %v3793_v27 = vld [vmem:[%s5676_s1 + $0x18c] ss:$16 sps:$4 sm:$0xff]   ;;  %v3752_v31 = vld [vmem:[%s5676_s1 + $0x24] ss:$16 sps:$4 sm:$0xff]  }
  0x1c   :  { %389 = vmatprep.subr.bf16.mxu0 %v3729_v43  ;;  %v4238_v43 = vcombine.low %v869_v33, %v872_v39  ;;  %451 = vmatpush1.bf16.msra.mxu1 %v3789_v15  ;;  %v3795_v33 = vld [vmem:[%s5676_s1 + $0x188] ss:$16 sps:$4 sm:$0xff]   ;;  %v3750_v37 = vld [vmem:[%s5676_s1 + $0x20] ss:$16 sps:$4 sm:$0xff]   ;;  %v3799_v40 = vld [vmem:[%s5676_s1 + $0x14c] ss:$16 sps:$4 sm:$0xff]  }
  0x1d   :  { %452 = vmatprep.subr.bf16.mxu1 %v3790_v17  ;;  %v3798_v39 = vld [vmem:[%s5676_s1 + $0x168] ss:$16 sps:$4 sm:$0xff]   ;;  %v3759_v42 = vld [vmem:[%s5676_s1 + $0x2e4] ss:$16 sps:$4 sm:$0xff]   ;;  %v3760_v9 = vld [vmem:[%s5676_s1 + $0x2c0] ss:$16 sps:$4 sm:$0xff]  }
  0x1e   :  { %v3801_v45 = vld [vmem:[%s5676_s1 + $0x148] ss:$16 sps:$4 sm:$0xff]   ;;  %v3764_v56 = vld [vmem:[%s5676_s1 + $0x2a0] ss:$16 sps:$4 sm:$0xff]   ;;  %v3769_v57 = vld [vmem:[%s5676_s1 + $0x284] ss:$16 sps:$4 sm:$0xff]  }
  0x1f   :  { %390 = vmatpush1.bf16.msra.mxu0 %v3731_v51  ;;  %v3361_v51 = vrot.slane %v851_v48, 9  ;;  %v3757_v48 = vld [vmem:[%s5676_s1 + $0x2e0] ss:$16 sps:$4 sm:$0xff]   ;;  %v3804_v11 = vld [vmem:[%s5676_s1 + $0x128] ss:$16 sps:$4 sm:$0xff]   ;;  %vm1341_vm6 = vcmask 1040384  }
  0x20   :  { %705 = vmatprep.subr.bf16.mxu0 %v3734_v52  ;;  %v3362_v52 = vrot.slane %v852_v49, 9  ;;  %v3762_v49 = vld [vmem:[%s5676_s1 + $0x2c4] ss:$16 sps:$4 sm:$0xff]   ;;  %v3811_v60 = vld [vmem:[%s5676_s1 + $0xc8] ss:$16 sps:$4 sm:$0xff]   ;;  %vm1628_vm8 = vcmask 1044484  }
  0x21   :  { %v863_v61 = vsel %vm4202_vm5, %v3361_v51, %v862_v3  ;;  %v885_v3 = vsel %vm4202_vm5, %v883_v55, %v884_v58  ;;  %v3805_v51 = vld [vmem:[%s5676_s1 + $0x10c] ss:$16 sps:$4 sm:$0xff]   ;;  %v3767_v58 = vld [vmem:[%s5676_s1 + $0x280] ss:$16 sps:$4 sm:$0xff]   ;;  %v3773_v59 = vld [vmem:[%s5676_s1 + $0x264] ss:$16 sps:$4 sm:$0xff]  }
  0x22   :  { %408 = vmatmul.mubr.bf16.vlgmr.msra.gmra.mxu0 %v4177_v63  ;;  %v4280_v8 = vcombine.low %v863_v61, %v866_v26  ;;  %v4289_v13 = vcombine.low %v882_v54, %v885_v3  ;;  %v3792_v26 = vld [vmem:[%s5676_s1 + $0x1a8] ss:$16 sps:$4 sm:$0xff]   ;;  %v4387_v54 = vcombine.low %v4109_v18, %v4114_v23  ;;  %v3810_v55 = vld [vmem:[%s5676_s1 + $0xec] ss:$16 sps:$4 sm:$0xff]   ;;  %v3776_v61 = vld [vmem:[%s5676_s1 + $0x244] ss:$16 sps:$4 sm:$0xff]  }
  0x23   :  { %706 = vmatpush1.bf16.msra.mxu0 %v3732_v4  ;;  %417 = vmatprep.mubr.bf16.mxu0 %v4004_v1  ;;  %v876_v4 = vsel %vm4202_vm5, %v3362_v52, %v875_v28  ;;  %v3747_v28 = vld [vmem:[%s5676_s1 + $0x40] ss:$16 sps:$4 sm:$0xff]   ;;  %v3807_v52 = vld [vmem:[%s5676_s1 + $0x108] ss:$16 sps:$4 sm:$0xff]   ;;  %v3813_v23 = vld [vmem:[%s5676_s1 + $0xcc] ss:$16 sps:$4 sm:$0xff]  }
  0x24   :  { %707 = vmatprep.subr.bf16.mxu0 %v3737_v7  ;;  %v162_v7 = vshll.u32 %v74_v47, 16  ;;  %v4282_v10 = vcombine.low %v876_v4, %v879_v50  ;;  %453 = vmatpush1.bf16.msra.mxu1 %v3792_v26  ;;  %v3802_v47 = vld [vmem:[%s5676_s1 + $0x12c] ss:$16 sps:$4 sm:$0xff]   ;;  %v3766_v50 = vld [vmem:[%s5676_s1 + $0x2a4] ss:$16 sps:$4 sm:$0xff]   ;;  %vm1771_vm1 = vcmask 1043456  }
  0x25   :  { %454 = vmatprep.subr.bf16.mxu1 %v3793_v27  ;;  %v3808_v18 = vld [vmem:[%s5676_s1 + $0xe8] ss:$16 sps:$4 sm:$0xff]   ;;  %v3816_v0 = vld [vmem:[%s5676_s1 + $0xac] ss:$16 sps:$4 sm:$0xff]   ;;  %v3774_v4 = vld [vmem:[%s5676_s1 + $0x240] ss:$16 sps:$4 sm:$0xff]  }
  0x26   :  { %v164_v22 = vrot.slane %v162_v7, 5  ;;  %v3814_v36 = vld [vmem:[%s5676_s1 + $0xa8] ss:$16 sps:$4 sm:$0xff]   ;;  %v3819_v38 = vld [vmem:[%s5676_s1 + $0x8c] ss:$16 sps:$4 sm:$0xff]   ;;  %v4451_v7 = vcombine.low %v4169_v53, %v4183_v2  ;;  %vm1773_vm4 = vcmask 1047556  }
  0x27   :  { %708 = vmatpush1.bf16.msra.mxu0 %v3735_v24  ;;  %v3749_v24 = vld [vmem:[%s5676_s1 + $0x44] ss:$16 sps:$4 sm:$0xff]   ;;  %v3822_v3 = vld [vmem:[%s5676_s1 + $0x6c] ss:$16 sps:$4 sm:$0xff]   ;;  %v3820_v53 = vld [vmem:[%s5676_s1 + $0x68] ss:$16 sps:$4 sm:$0xff]  }
  0x28   :  { %709 = vmatprep.subr.bf16.mxu0 %v3740_v29  ;;  %v155_v29 = vsel %vm4151_vm2, %v150_v20, %v4231_v32  ;;  %v165_v30 = vsel %vm4151_vm2, %v160_v21, %v164_v22  ;;  %v3755_v32 = vld [vmem:[%s5676_s1 + $0x4] ss:$16 sps:$4 sm:$0xff]   ;;  %455 = vmatpush1.bf16.msra.mxu1 %v3795_v33  ;;  %v3825_v2 = vld [vmem:[%s5676_s1 + $0x4c] ss:$16 sps:$4 sm:$0xff]   ;;  %v3781_v15 = vld [vmem:[%s5676_s1 + $0x200] ss:$16 sps:$4 sm:$0xff]  }
  0x29   :  { %v4327_v34 = vcombine.low %v155_v29, %v165_v30  ;;  %v3780_v5 = vld [vmem:[%s5676_s1 + $0x224] ss:$16 sps:$4 sm:$0xff]   ;;  %v3823_v17 = vld [vmem:[%s5676_s1 + $0x48] ss:$16 sps:$4 sm:$0xff]   ;;  %v3834_v22 = vld [vmem:[%s5676_s1 + $0x2ec] ss:$16 sps:$4 sm:$0xff]  }
  0x2a   :  { %418 = vmatmul.mubr.bf16.gmra.mxu0 %v4216_v25  ;;  %v3826_v20 = vld [vmem:[%s5676_s1 + $0x28] ss:$16 sps:$4 sm:$0xff]   ;;  %v3837_v26 = vld [vmem:[%s5676_s1 + $0x2cc] ss:$16 sps:$4 sm:$0xff]   ;;  %vm1626_vm7 = vsmask.f32 256 }
  0x2b   :  { %710 = vmatpush1.bf16.msra.mxu0 %v3738_v35  ;;  %427 = vmatprep.mubr.bf16.mxu0 %v4004_v1  ;;  %v3796_v35 = vld [vmem:[%s5676_s1 + $0x16c] ss:$16 sps:$4 sm:$0xff]   ;;  %v3829_v21 = vld [vmem:[%s5676_s1 + $0x8] ss:$16 sps:$4 sm:$0xff]   ;;  %vm1629_vm9 = vsmask.f32 4352  ;;  %vm1627_vm10 = vmand %vm1341_vm6, %vm1626_vm7 }
  0x2c   :  { %711 = vmatprep.subr.bf16.mxu0 %v3743_v41  ;;  %456 = vmatprep.subr.bf16.mxu1 %v3796_v35  ;;  %v3753_v41 = vld [vmem:[%s5676_s1] ss:$16 sps:$4 sm:$0xff]   ;;  %v3835_v27 = vld [vmem:[%s5676_s1 + $0x2c8] ss:$16 sps:$4 sm:$0xff]   ;;  %v3843_v30 = vld [vmem:[%s5676_s1 + $0x28c] ss:$16 sps:$4 sm:$0xff]  }
  0x2d   :  { %457 = vmatpush1.bf16.msra.mxu1 %v3798_v39  ;;  %v3838_v29 = vld [vmem:[%s5676_s1 + $0x2a8] ss:$16 sps:$4 sm:$0xff]   ;;  %v3846_v33 = vld [vmem:[%s5676_s1 + $0x26c] ss:$16 sps:$4 sm:$0xff]   ;;  %vm1638_vm11 = vsmask.f32 7938  ;;  %vm1630_vm12 = vmand %vm1628_vm8, %vm1629_vm9 }
  0x2e   :  { %458 = vmatprep.subr.bf16.mxu1 %v3799_v40  ;;  %v3849_v35 = vld [vmem:[%s5676_s1 + $0x24c] ss:$16 sps:$4 sm:$0xff]   ;;  %v3850_v39 = vld [vmem:[%s5676_s1 + $0x228] ss:$16 sps:$4 sm:$0xff]   ;;  %vm1640_vm13 = vsmask.f32 7954  ;;  %vm4661_vm14 = vmor %vm1630_vm12, %vm1627_vm10 }
  0x2f   :  { %712 = vmatpush1.bf16.msra.mxu0 %v3741_v6  ;;  %v3817_v6 = vld [vmem:[%s5676_s1 + $0x88] ss:$16 sps:$4 sm:$0xff]   ;;  %v3855_v40 = vld [vmem:[%s5676_s1 + $0x20c] ss:$16 sps:$4 sm:$0xff]   ;;  %vm1639_vm15 = vmand %vm1341_vm6, %vm1638_vm11  ;;  %vm1689_vm12 = vsmask.f32 4368 }
  0x30   :  { %713 = vmatprep.subr.bf16.mxu0 %v3746_v12  ;;  %v3783_v12 = vld [vmem:[%s5676_s1 + $0x204] ss:$16 sps:$4 sm:$0xff]   ;;  %vm1641_vm0 = vmand %vm1628_vm8, %vm1640_vm13 }
  0x31   :  { %459 = vmatpush1.bf16.msra.mxu1 %v3801_v45  ;;  %v1372_v45 = vld [vmem:[%s5678_s3 + $0xe0] sm:$0xff]  ;;  %vm1642_vm3 = vmor %vm1641_vm0, %vm1639_vm15 }
  0x32   :  { %428 = vmatmul.mubr.bf16.gmra.mxu0 %v4294_v16  ;;  %460 = vmatprep.subr.bf16.mxu1 %v3802_v47  ;;  %v1371_v47 = vld [vmem:[%s5678_s3 + $0xd8] sm:$0xff]  ;;  %vm4674_vm9 = vmand %vm1771_vm1, %vm1638_vm11  ;;  %vm1486_vm11 = vcmask 64512  }
  0x33   :  { %714 = vmatpush1.bf16.msra.mxu0 %v3744_v19  ;;  %437 = vmatprep.mubr.bf16.mxu0 %v4004_v1  ;;  %v3828_v19 = vld [vmem:[%s5676_s1 + $0x2c] ss:$16 sps:$4 sm:$0xff]   ;;  %vm4679_vm10 = vmand %vm1773_vm4, %vm1640_vm13 }
  0x34   :  { %715 = vmatprep.subr.bf16.mxu0 %v3749_v24  ;;  %v3832_v24 = vld [vmem:[%s5676_s1 + $0x2e8] ss:$16 sps:$4 sm:$0xff]   ;;  %vm1775_vm8 = vmor %vm4679_vm10, %vm4674_vm9 }
  0x35   :  { %461 = vmatpush1.bf16.msra.mxu1 %v3804_v11  ;;  %v1369_v11 = vld [vmem:[%s5678_s3 + $0xc8] sm:$0xff]  ;;  %vm5151_vm13 = vmor %vm1626_vm7, %vm1689_vm12 }
  0x36   :  { %462 = vmatprep.subr.bf16.mxu1 %v3805_v51  ;;  %v1368_v51 = vld [vmem:[%s5678_s3 + $0xc0] sm:$0xff] }
  0x37   :  { %716 = vmatpush1.bf16.msra.mxu0 %v3747_v28  ;;  %v3840_v28 = vld [vmem:[%s5676_s1 + $0x2ac] ss:$16 sps:$4 sm:$0xff]  }
  0x38   :  { %717 = vmatprep.subr.bf16.mxu0 %v3752_v31  ;;  %v3841_v31 = vld [vmem:[%s5676_s1 + $0x288] ss:$16 sps:$4 sm:$0xff]  }
  0x39   :  { %463 = vmatpush1.bf16.msra.mxu1 %v3807_v52  ;;  %v1352_v52 = vld [vmem:[%s5678_s3 + $0x40] sm:$0xff] }
  0x3a   :  { %438 = vmatmul.mubr.bf16.gmra.mxu0 %v4327_v34  ;;  %778 = vmatprep.subr.bf16.mxu1 %v3810_v55  ;;  %v1351_v55 = vld [vmem:[%s5678_s3 + $0x38] sm:$0xff] }
  0x3b   :  { %718 = vmatpush1.bf16.msra.mxu0 %v3750_v37  ;;  %737 = vmatprep.mubr.bf16.mxu0 %v4004_v1  ;;  %v3847_v37 = vld [vmem:[%s5676_s1 + $0x248] ss:$16 sps:$4 sm:$0xff]  }
  0x3c   :  { %719 = vmatprep.subr.bf16.mxu0 %v3755_v32  ;;  %481 = vmatmul.mubr.bf16.vlgmr.msra.gmra.mxu1 %v4177_v63  ;;  %v3771_v63 = vld [vmem:[%s5676_s1 + $0x260] ss:$16 sps:$4 sm:$0xff]   ;;  %v3852_v32 = vld [vmem:[%s5676_s1 + $0x22c] ss:$16 sps:$4 sm:$0xff]  }
  0x3d   :  { %779 = vmatpush1.bf16.msra.mxu1 %v3808_v18  ;;  %490 = vmatprep.mubr.bf16.mxu1 %v4004_v1  ;;  %v1365_v18 = vld [vmem:[%s5678_s3 + $0xa8] sm:$0xff] }
  0x3e   :  { %780 = vmatprep.subr.bf16.mxu1 %v3813_v23  ;;  %v1349_v23 = vld [vmem:[%s5678_s3 + $0x28] sm:$0xff] }
  0x3f   :  { %720 = vmatpush1.bf16.msra.mxu0 %v3753_v41  ;;  %v3853_v41 = vld [vmem:[%s5676_s1 + $0x208] ss:$16 sps:$4 sm:$0xff]  }
  0x40   :  { %1095 = vmatprep.subr.bf16.mxu0 %v3759_v42  ;;  %v1375_v42 = vld [vmem:[%s5678_s3 + $0xf8] sm:$0xff] }
  0x41   :  { %781 = vmatpush1.bf16.msra.mxu1 %v3811_v60  ;;  %v1363_v60 = vld [vmem:[%s5678_s3 + $0x98] sm:$0xff] }
  0x42   :  { %738 = vmatmul.mubr.bf16.vlgmr.msra.gmra.mxu0 %v4357_v46  ;;  %782 = vmatprep.subr.bf16.mxu1 %v3816_v0  ;;  %v1362_v0 = vld [vmem:[%s5678_s3 + $0x90] sm:$0xff] }
  0x43   :  { %1096 = vmatpush1.bf16.msra.mxu0 %v3757_v48  ;;  %747 = vmatprep.mubr.bf16.mxu0 %v4004_v1  ;;  %v1355_v48 = vld [vmem:[%s5678_s3 + $0x58] sm:$0xff] }
  0x44   :  { %1097 = vmatprep.subr.bf16.mxu0 %v3762_v49  ;;  %491 = vmatmul.mubr.bf16.gmra.mxu1 %v4216_v25  ;;  %v3778_v25 = vld [vmem:[%s5676_s1 + $0x220] ss:$16 sps:$4 sm:$0xff]  }
  0x45   :  { %783 = vmatpush1.bf16.msra.mxu1 %v3814_v36  ;;  %500 = vmatprep.mubr.bf16.mxu1 %v4004_v1  ;;  %v1370_v49 = vld [vmem:[%s5678_s3 + $0xd0] sm:$0xff]  ;;  %v1345_v36 = vld [vmem:[%s5678_s3 + $0x8] sm:$0xff] }
  0x46   :  { %784 = vmatprep.subr.bf16.mxu1 %v3819_v38  ;;  %v1360_v38 = vld [vmem:[%s5678_s3 + $0x80] sm:$0xff] }
  0x47   :  { %1098 = vmatpush1.bf16.msra.mxu0 %v3760_v9  ;;  %v1354_v9 = vld [vmem:[%s5678_s3 + $0x50] sm:$0xff] }
  0x48   :  { %1099 = vmatprep.subr.bf16.mxu0 %v3766_v50  ;;  %v1353_v50 = vld [vmem:[%s5678_s3 + $0x48] sm:$0xff] }
  0x49   :  { %785 = vmatpush1.bf16.msra.mxu1 %v3817_v6  ;;  %v1635_v6 = vld [vmem:[#allocation2] sm:$0x11] }
  0x4a   :  { %748 = vmatmul.mubr.bf16.gmra.mxu0 %v4387_v54  ;;  %786 = vmatprep.subr.bf16.mxu1 %v3822_v3 }
  0x4b   :  { %1100 = vmatpush1.bf16.msra.mxu0 %v3764_v56  ;;  %757 = vmatprep.mubr.bf16.mxu0 %v4004_v1  ;;  %v1366_v56 = vld [vmem:[%s5678_s3 + $0xb0] sm:$0xff] }
  0x4c   :  { %1101 = vmatprep.subr.bf16.mxu0 %v3769_v57  ;;  %501 = vmatmul.mubr.bf16.gmra.mxu1 %v4294_v16  ;;  %v3831_v16 = vld [vmem:[%s5676_s1 + $0xc] ss:$16 sps:$4 sm:$0xff]   ;;  %v1350_v57 = vld [vmem:[%s5678_s3 + $0x30] sm:$0xff] }
  0x4d   :  { %787 = vmatpush1.bf16.msra.mxu1 %v3820_v53  ;;  %510 = vmatprep.mubr.bf16.mxu1 %v4004_v1  ;;  %v1646_v53 = vld [vmem:[#allocation2 + $0x20] sm:$0x11] }
  0x4e   :  { %788 = vmatprep.subr.bf16.mxu1 %v3825_v2 }
  0x4f   :  { %1102 = vmatpush1.bf16.msra.mxu0 %v3767_v58  ;;  %v1364_v58 = vld [vmem:[%s5678_s3 + $0xa0] sm:$0xff] }
  0x50   :  { %1103 = vmatprep.subr.bf16.mxu0 %v3773_v59  ;;  %v1348_v59 = vld [vmem:[%s5678_s3 + $0x20] sm:$0xff] }
  0x51   :  { %789 = vmatpush1.bf16.msra.mxu1 %v3823_v17  ;;  %v5706_v17 = vmov 0 }
  0x52   :  { %758 = vmatmul.mubr.bf16.gmra.mxu0 %v4419_v62  ;;  %790 = vmatprep.subr.bf16.mxu1 %v3828_v19  ;;  %v5707_v17 = vsel %vm4674_vm9, 4294967295, %v5706_v17  ;;  %v5709_v19 = vmov 0 }
  0x53   :  { %1104 = vmatpush1.bf16.msra.mxu0 %v3771_v63  ;;  %767 = vmatprep.mubr.bf16.mxu0 %v4004_v1  ;;  %v1346_v63 = vld [vmem:[%s5678_s3 + $0x10] sm:$0xff]  ;;  %5708 = vst [vmem:[#allocation6_spill] sm:$0xff] %v5707_v17  ;;  %v5710_v19 = vsel %vm4679_vm10, 4294967295, %v5709_v19 }
  0x54   :  { %1105 = vmatprep.subr.bf16.mxu0 %v3776_v61  ;;  %511 = vmatmul.mubr.bf16.gmra.mxu1 %v4327_v34  ;;  %v3844_v34 = vld [vmem:[%s5676_s1 + $0x268] ss:$16 sps:$4 sm:$0xff]   ;;  %5711 = vst [vmem:[#allocation7_spill] sm:$0xff] %v5710_v19 }
  0x55   :  { %791 = vmatpush1.bf16.msra.mxu1 %v3826_v20  ;;  %810 = vmatprep.mubr.bf16.mxu1 %v4004_v1  ;;  %v1361_v61 = vld [vmem:[%s5678_s3 + $0x88] sm:$0xff] }
  0x56   :  { %792 = vmatprep.subr.bf16.mxu1 %v3831_v16 }
  0x57   :  { %1106 = vmatpush1.bf16.msra.mxu0 %v3774_v4  ;;  %v1344_v4 = vld [vmem:[%s5678_s3] sm:$0xff] }
  0x58   :  { %1107 = vmatprep.subr.bf16.mxu0 %v3780_v5  ;;  %v1632_v5 = vld [vmem:[#allocation2 + $0x18] sm:$0x11] }
  0x59   :  { %793 = vmatpush1.bf16.msra.mxu1 %v3829_v21  ;;  %v1633_v3 = vsel %vm4661_vm14, 0, %v1632_v5 }
  0x5a   :  { %768 = vmatmul.mubr.bf16.gmra.mxu0 %v4451_v7  ;;  %1168 = vmatprep.subr.bf16.mxu1 %v3834_v22  ;;  %1634 = vst [vmem:[#allocation2 + $0x18] sm:$0x11] %v1633_v3 }
  0x5b   :  { %1108 = vmatpush1.bf16.msra.mxu0 %v3778_v25  ;;  %1127 = vmatprep.mubr.bf16.mxu0 %v4004_v1  ;;  %v1636_v25 = vsel %vm4661_vm14, 0, %v1635_v6 }
  0x5c   :  { %1109 = vmatprep.subr.bf16.mxu0 %v3783_v12  ;;  %811 = vmatmul.mubr.bf16.vlgmr.msra.gmra.mxu1 %v4357_v46  ;;  %v1356_v46 = vld [vmem:[%s5678_s3 + $0x60] sm:$0xff]  ;;  %v1643_v12 = vld [vmem:[#allocation2 + $0x48] sm:$0x11]  ;;  %1637 = vst [vmem:[#allocation2] sm:$0x11] %v1636_v25 }
  0x5d   :  { %1169 = vmatpush1.bf16.msra.mxu1 %v3832_v24  ;;  %820 = vmatprep.mubr.bf16.mxu1 %v4004_v1  ;;  %v1644_v2 = vsel %vm1642_vm3, 0, %v1643_v12 }
  0x5e   :  { %1170 = vmatprep.subr.bf16.mxu1 %v3837_v26  ;;  %1645 = vst [vmem:[#allocation2 + $0x48] sm:$0x11] %v1644_v2 }
  0x5f   :  { %1110 = vmatpush1.bf16.msra.mxu0 %v3781_v15  ;;  %v1647_v15 = vsel %vm1642_vm3, 0, %v1646_v53 }
  0x60   :  { %1648 = vst [vmem:[#allocation2 + $0x20] sm:$0x11] %v1647_v15 }
  0x61   :  { %1171 = vmatpush1.bf16.msra.mxu1 %v3835_v27 }
  0x62   :  { %1128 = vmatmul.mubr.bf16.vlgmr.msra.gmra.mxu0 %v4280_v8  ;;  %1172 = vmatprep.subr.bf16.mxu1 %v3840_v28 }
  0x63   :  { %1137 = vmatprep.mubr.bf16.mxu0 %v4004_v1 }
  0x64   :  { %821 = vmatmul.mubr.bf16.gmra.mxu1 %v4387_v54  ;;  %v1367_v54 = vld [vmem:[%s5678_s3 + $0xb8] sm:$0xff] }
  0x65   :  { %1173 = vmatpush1.bf16.msra.mxu1 %v3838_v29  ;;  %830 = vmatprep.mubr.bf16.mxu1 %v4004_v1 }
  0x66   :  { %1174 = vmatprep.subr.bf16.mxu1 %v3843_v30 }
  0x69   :  { %1175 = vmatpush1.bf16.msra.mxu1 %v3841_v31 }
  0x6a   :  { %1138 = vmatmul.mubr.bf16.gmra.mxu0 %v4238_v43  ;;  %1176 = vmatprep.subr.bf16.mxu1 %v3846_v33 }
  0x6b   :  { %1147 = vmatprep.mubr.bf16.mxu0 %v4004_v1 }
  0x6c   :  { %831 = vmatmul.mubr.bf16.gmra.mxu1 %v4419_v62  ;;  %v1347_v62 = vld [vmem:[%s5678_s3 + $0x18] sm:$0xff] }
  0x6d   :  { %1177 = vmatpush1.bf16.msra.mxu1 %v3844_v34  ;;  %840 = vmatprep.mubr.bf16.mxu1 %v4004_v1 }
  0x6e   :  { %1178 = vmatprep.subr.bf16.mxu1 %v3849_v35 }
  0x71   :  { %1179 = vmatpush1.bf16.msra.mxu1 %v3847_v37 }
  0x72   :  { %1148 = vmatmul.mubr.bf16.gmra.mxu0 %v4282_v10  ;;  %1180 = vmatprep.subr.bf16.mxu1 %v3852_v32 }
  0x73   :  { %1157 = vmatprep.mubr.bf16.mxu0 %v4004_v1 }
  0x74   :  { %841 = vmatmul.mubr.bf16.gmra.mxu1 %v4451_v7  ;;  %v5703_v7 = vmov 0 }
  0x75   :  { %1181 = vmatpush1.bf16.msra.mxu1 %v3850_v39  ;;  %1200 = vmatprep.mubr.bf16.mxu1 %v4004_v1  ;;  %v5704_v7 = vsel %vm4661_vm14, 4294967295, %v5703_v7 }
  0x76   :  { %1182 = vmatprep.subr.bf16.mxu1 %v3855_v40  ;;  %5705 = vst [vmem:[#allocation5_spill] sm:$0xff] %v5704_v7 }
  0x79   :  { %1183 = vmatpush1.bf16.msra.mxu1 %v3853_v41 }
  0x7a   :  { %1158 = vmatmul.mubr.bf16.gmra.mxu0 %v4289_v13  ;;  %3635 = vmatprep.subr.mxu1 %v1375_v42 }
  0x7c   :  { %1201 = vmatmul.mubr.bf16.vlgmr.msra.gmra.mxu1 %v4280_v8  ;;  %v1359_v8 = vld [vmem:[%s5678_s3 + $0x78] sm:$0xff] }
  0x7d   :  { %1210 = vmatprep.mubr.bf16.mxu1 %v4004_v1  ;;  %3636 = vmatpush3.msra.mxu1 %v1359_v8 }
  0x84   :  { %1211 = vmatmul.mubr.bf16.gmra.mxu1 %v4238_v43  ;;  %v1374_v43 = vld [vmem:[%s5678_s3 + $0xf0] sm:$0xff] }
  0x85   :  { %1220 = vmatprep.mubr.bf16.mxu1 %v4004_v1  ;;  %3637 = vmatprep.subr.mxu1 %v1374_v43 }
  0x8c   :  { %1221 = vmatmul.mubr.bf16.gmra.mxu1 %v4282_v10  ;;  %v1373_v10 = vld [vmem:[%s5678_s3 + $0xe8] sm:$0xff] }
  0x8d   :  { %1230 = vmatprep.mubr.bf16.mxu1 %v4004_v1  ;;  %v1358_v1 = vld [vmem:[%s5678_s3 + $0x70] sm:$0xff] }
  0x8e   :  { %3638 = vmatpush3.msra.mxu1 %v1358_v1 }
  0x8f   :  { %3639 = vmatprep.subr.mxu1 %v1373_v10 }
  0x94   :  { %1231 = vmatmul.mubr.bf16.gmra.mxu1 %v4289_v13  ;;  %v1357_v13 = vld [vmem:[%s5678_s3 + $0x68] sm:$0xff] }
  0x95   :  { %3640 = vmatpush3.msra.mxu1 %v1357_v13 }
  0x96   :  { %3641 = vmatprep.subr.mxu1 %v1372_v45 }
  0x97   :  { %3642 = vmatpush3.msra.mxu1 %v1356_v46 }
  0x98   :  { %3643 = vmatprep.subr.mxu1 %v1371_v47 }
  0x99   :  { %3644 = vmatpush3.msra.mxu1 %v1355_v48 }
  0x9a   :  { %3645 = vmatprep.subr.mxu1 %v1370_v49 }
  0x9b   :  { %3646 = vmatpush3.msra.mxu1 %v1354_v9 }
  0x9c   :  { %3647 = vmatprep.subr.mxu1 %v1369_v11 }
  0x9d   :  { %3648 = vmatpush3.msra.mxu1 %v1353_v50 }
  0x9e   :  { %3649 = vmatprep.subr.mxu1 %v1368_v51 }
  0x9f   :  { %3650 = vmatpush3.msra.mxu1 %v1352_v52 }
  0xa0   :  { %3651 = vmatprep.subr.mxu1 %v1367_v54 }
  0xa1   :  { %3652 = vmatpush3.msra.mxu1 %v1351_v55 }
  0xa2   :  { %3653 = vmatprep.subr.mxu1 %v1366_v56 }
  0xa3   :  { %3654 = vmatpush3.msra.mxu1 %v1350_v57 }
  0xa4   :  { %3655 = vmatprep.subr.mxu1 %v1365_v18 }
  0xa5   :  { %3656 = vmatpush3.msra.mxu1 %v1349_v23 }
  0xa6   :  { %3657 = vmatprep.subr.mxu1 %v1364_v58 }
  0xa7   :  { %3658 = vmatpush3.msra.mxu1 %v1348_v59 }
  0xa8   :  { %3659 = vmatprep.subr.mxu1 %v1363_v60 }
  0xa9   :  { %3660 = vmatpush3.msra.mxu1 %v1347_v62 }
  0xaa   :  { %3661 = vmatprep.subr.mxu1 %v1362_v0 }
  0xab   :  { %3662 = vmatpush3.msra.mxu1 %v1346_v63 }
  0xac   :  { %3663 = vmatprep.subr.mxu1 %v1361_v61 }
  0xad   :  { %3664 = vmatpush3.msra.mxu1 %v1345_v36 }
  0xae   :  { %3665 = vmatprep.subr.mxu1 %v1360_v38 }
  0xaf   :  { %3666 = vmatpush3.msra.mxu1 %v1344_v4 }
  0xe2   :  { %v409_v20 = vpop.f32.mrf.mxu0 }
  0xe4   :  { %v411_v16 = vpop.f32.mrf.mxu0 }
  0xe6   :  { %v413_v21 = vpop.f32.mrf.mxu0 }
  0xe8   :  { %v415_v22 = vpop.f32.mrf.mxu0 }
  0xea   :  { %v419_v24 = vpop.f32.mrf.mxu0 }
  0xec   :  { %v421_v26 = vpop.f32.mrf.mxu0 }
  0xee   :  { %v423_v27 = vpop.f32.mrf.mxu0 }
  0xf0   :  { %v425_v28 = vpop.f32.mrf.mxu0 }
  0xf2   :  { %v4687_v29 = vpop.f32.mrf.mxu0 }
  0xf4   :  { %v4689_v30 = vpop.f32.mrf.mxu0 }
  0xf6   :  { %v4691_v31 = vpop.f32.mrf.mxu0 }
  0xf8   :  { %v4693_v33 = vpop.f32.mrf.mxu0 }
  0xfa   :  { %v4695_v34 = vpop.f32.mrf.mxu0 }
  0xfc   :  { %v4697_v35 = vpop.f32.mrf.mxu0  ;;  %v482_v1 = vpop.f32.mrf.mxu1 }
  0xfe   :  { %v4699_v37 = vpop.f32.mrf.mxu0  ;;  %v484_v13 = vpop.f32.mrf.mxu1 }
 0x100   :  { %v4701_v32 = vpop.f32.mrf.mxu0  ;;  %v486_v46 = vpop.f32.mrf.mxu1 }
 0x102   :  { %v739_v39 = vpop.f32.mrf.mxu0  ;;  %v4703_v48 = vpop.f32.mrf.mxu1 }
 0x103   :  { %v740_v53 = vadd.f32 %v739_v39, %v409_v20 }
 0x104   :  { %v741_v40 = vpop.f32.mrf.mxu0  ;;  %v4705_v9 = vpop.f32.mrf.mxu1 }
 0x105   :  { %v742_v7 = vadd.f32 %v741_v40, %v411_v16 }
 0x106   :  { %v743_v41 = vpop.f32.mrf.mxu0  ;;  %v4707_v50 = vpop.f32.mrf.mxu1 }
 0x107   :  { %v744_v3 = vadd.f32 %v743_v41, %v413_v21 }
 0x108   :  { %v745_v42 = vpop.f32.mrf.mxu0  ;;  %v4709_v52 = vpop.f32.mrf.mxu1 }
 0x109   :  { %v746_v2 = vadd.f32 %v745_v42, %v415_v22 }
 0x10a   :  { %v749_v8 = vpop.f32.mrf.mxu0  ;;  %v4711_v55 = vpop.f32.mrf.mxu1 }
 0x10b   :  { %v750_v15 = vadd.f32 %v749_v8, %v419_v24 }
 0x10c   :  { %v751_v43 = vpop.f32.mrf.mxu0  ;;  %v4713_v57 = vpop.f32.mrf.mxu1 }
 0x10e   :  { %v753_v10 = vpop.f32.mrf.mxu0  ;;  %v4717_v23 = vpop.f32.mrf.mxu1 }
 0x110   :  { %v755_v45 = vpop.f32.mrf.mxu0  ;;  %v4721_v59 = vpop.f32.mrf.mxu1 }
 0x112   :  { %v759_v47 = vpop.f32.mrf.mxu0  ;;  %v4723_v62 = vpop.f32.mrf.mxu1 }
 0x113   :  { %5712 = vst [vmem:[#allocation8_spill] sm:$0xff] %v4723_v62  ;;  %v754_v62 = vadd.f32 %v753_v10, %v423_v27  ;;  %v760_v24 = vadd.f32 %v759_v47, %v4687_v29 }
 0x114   :  { %v761_v49 = vpop.f32.mrf.mxu0  ;;  %v4725_v63 = vpop.f32.mrf.mxu1 }
 0x115   :  { %5713 = vst [vmem:[#allocation9_spill] sm:$0xff] %v4725_v63  ;;  %v762_v39 = vadd.f32 %v761_v49, %v4689_v30 }
 0x116   :  { %v763_v11 = vpop.f32.mrf.mxu0  ;;  %v4727_v36 = vpop.f32.mrf.mxu1 }
 0x117   :  { %5714 = vst [vmem:[#allocation10_spill] sm:$0xff] %v4727_v36  ;;  %v752_v36 = vadd.f32 %v751_v43, %v421_v26  ;;  %v764_v26 = vadd.f32 %v763_v11, %v4691_v31 }
 0x118   :  { %v765_v51 = vpop.f32.mrf.mxu0  ;;  %v4729_v4 = vpop.f32.mrf.mxu1 }
 0x119   :  { %5715 = vst [vmem:[#allocation11_spill] sm:$0xff] %v4729_v4  ;;  %v766_v43 = vadd.f32 %v765_v51, %v4693_v33 }
 0x11a   :  { %v769_v54 = vpop.f32.mrf.mxu0  ;;  %v4731_v6 = vpop.f32.mrf.mxu1 }
 0x11b   :  { %5716 = vst [vmem:[#allocation12_spill] sm:$0xff] %v4731_v6  ;;  %v756_v6 = vadd.f32 %v755_v45, %v425_v28  ;;  %v770_v29 = vadd.f32 %v769_v54, %v4695_v34 }
 0x11c   :  { %v771_v56 = vpop.f32.mrf.mxu0  ;;  %v812_v12 = vpop.f32.mrf.mxu1 }
 0x11d   :  { %v4735_v17 = vadd.f32 %v812_v12, %v482_v1  ;;  %v772_v34 = vadd.f32 %v771_v56, %v4697_v35 }
 0x11e   :  { %v4715_v18 = vpop.f32.mrf.mxu0  ;;  %v814_v19 = vpop.f32.mrf.mxu1 }
 0x11f   :  { %v4743_v20 = vadd.f32 %v814_v19, %v484_v13 }
 0x120   :  { %v4719_v58 = vpop.f32.mrf.mxu0  ;;  %v816_v22 = vpop.f32.mrf.mxu1 }
 0x121   :  { %v4756_v8 = vadd.f32 %v816_v22, %v486_v46 }
 0x122   :  { %v1129_v60 = vpop.f32.mrf.mxu0  ;;  %v818_v19 = vpop.f32.mrf.mxu1 }
 0x123   :  { %v4737_v63 = vadd.f32 %v1129_v60, %v740_v53  ;;  %v4771_v13 = vadd.f32 %v818_v19, %v4703_v48 }
 0x124   :  { %v1131_v0 = vpop.f32.mrf.mxu0  ;;  %v822_v33 = vpop.f32.mrf.mxu1 }
 0x125   :  { %v4747_v42 = vadd.f32 %v1131_v0, %v742_v7  ;;  %v1299_v7 = vmul.f32 %v4737_v63, %v4737_v63  ;;  %v4785_v54 = vadd.f32 %v822_v33, %v4705_v9 }
 0x126   :  { %v1133_v61 = vpop.f32.mrf.mxu0  ;;  %v824_v35 = vpop.f32.mrf.mxu1 }
 0x127   :  { %v4733_v14 = vadd.f32 %v1133_v61, %v744_v3  ;;  %v1300_v45 = vmul.f32 %v4747_v42, %v4747_v42  ;;  %v4797_v9 = vadd.f32 %v824_v35, %v4707_v50 }
 0x128   :  { %v1135_v38 = vpop.f32.mrf.mxu0 }
 0x129   :  { %v4739_v4 = vadd.f32 %v1135_v38, %v746_v2  ;;  %v1301_v27 = vmul.f32 %v4733_v14, %v4733_v14  ;;  %v1273_v46 = vadd.f32 %v4733_v14, %v4737_v63 }
 0x12a   :  { %v1139_v5 = vpop.f32.mrf.mxu0 }
 0x12b   :  { %v4741_v21 = vadd.f32 %v1139_v5, %v750_v15  ;;  %v1302_v30 = vmul.f32 %v4739_v4, %v4739_v4  ;;  %v1315_v49 = vadd.f32 %v1301_v27, %v1299_v7  ;;  %v1286_v56 = vadd.f32 %v4739_v4, %v4747_v42 }
 0x12c   :  { %v1141_v25 = vpop.f32.mrf.mxu0 }
 0x12d   :  { %v4749_v16 = vadd.f32 %v1141_v25, %v752_v36  ;;  %v1303_v31 = vmul.f32 %v4741_v21, %v4741_v21  ;;  %v1328_v60 = vadd.f32 %v1302_v30, %v1300_v45 }
 0x12e   :  { %v1143_v44 = vpop.f32.mrf.mxu0 }
 0x12f   :  { %v4754_v28 = vadd.f32 %v1143_v44, %v754_v62  ;;  %v1304_v47 = vmul.f32 %v4749_v16, %v4749_v16  ;;  %v1274_v62 = vadd.f32 %v1273_v46, %v4741_v21  ;;  %v1316_v61 = vadd.f32 %v1315_v49, %v1303_v31 }
 0x130   :  { %v1145_v41 = vpop.f32.mrf.mxu0  ;;  %v1287_v3 = vadd.f32 %v1286_v56, %v4749_v16 }
 0x131   :  { %v4766_v1 = vadd.f32 %v1145_v41, %v756_v6  ;;  %v1305_v11 = vmul.f32 %v4754_v28, %v4754_v28  ;;  %v826_v6 = vpop.f32.mrf.mxu1  ;;  %v1329_v25 = vadd.f32 %v1328_v60, %v1304_v47  ;;  %v1275_v12 = vadd.f32 %v1274_v62, %v4754_v28 }
 0x132   :  { %v1149_v40 = vpop.f32.mrf.mxu0 }
 0x133   :  { %v4768_v44 = vadd.f32 %v1149_v40, %v760_v24  ;;  %v1306_v36 = vmul.f32 %v4766_v1, %v4766_v1  ;;  %v1317_v2 = vadd.f32 %v1316_v61, %v1305_v11  ;;  %v4808_v24 = vadd.f32 %v826_v6, %v4709_v52  ;;  %v828_v50 = vpop.f32.mrf.mxu1 }
 0x134   :  { %v1151_v10 = vpop.f32.mrf.mxu0  ;;  %v4819_v31 = vadd.f32 %v828_v50, %v4711_v55 }
 0x135   :  { %v4782_v51 = vadd.f32 %v1151_v10, %v762_v39  ;;  %v1307_v38 = vmul.f32 %v4768_v44, %v4768_v44  ;;  %v774_v39 = vadd.f32 %v4715_v18, %v4699_v37  ;;  %v1276_v27 = vadd.f32 %v1275_v12, %v4768_v44  ;;  %v832_v52 = vpop.f32.mrf.mxu1 }
 0x136   :  { %v1153_v48 = vpop.f32.mrf.mxu0  ;;  %v1330_v19 = vadd.f32 %v1329_v25, %v1306_v36  ;;  %v4830_v49 = vadd.f32 %v832_v52, %v4713_v57 }
 0x137   :  { %v4790_v0 = vadd.f32 %v1153_v48, %v764_v26  ;;  %v1308_v15 = vmul.f32 %v4782_v51, %v4782_v51  ;;  %v1288_v26 = vadd.f32 %v1287_v3, %v4766_v1  ;;  %v834_v55 = vpop.f32.mrf.mxu1 }
 0x138   :  { %v1155_v5 = vpop.f32.mrf.mxu0 }
 0x139   :  { %v4801_v53 = vadd.f32 %v1155_v5, %v766_v43  ;;  %v1309_v41 = vmul.f32 %v4790_v0, %v4790_v0  ;;  %v1318_v43 = vadd.f32 %v1317_v2, %v1307_v38  ;;  %v1289_v10 = vadd.f32 %v1288_v26, %v4782_v51 }
 0x13a   :  { %v1159_v22 = vpop.f32.mrf.mxu0  ;;  %v1277_v37 = vadd.f32 %v1276_v27, %v4790_v0  ;;  %v1331_v45 = vadd.f32 %v1330_v19, %v1308_v15  ;;  %v5717_v15 = vld [vmem:[#allocation8_spill] sm:$0xff]  ;;  %v5718_v19 = vld [vmem:[#allocation9_spill] sm:$0xff] }
 0x13b   :  { %v4814_v40 = vadd.f32 %v1159_v22, %v770_v29  ;;  %v1310_v7 = vmul.f32 %v4801_v53, %v4801_v53  ;;  %v776_v29 = vadd.f32 %v4719_v58, %v4701_v32  ;;  %v1319_v46 = vadd.f32 %v1318_v43, %v1309_v41  ;;  %v836_v58 = vpop.f32.mrf.mxu1 }
 0x13c   :  { %v1161_v30 = vpop.f32.mrf.mxu0  ;;  %v1290_v11 = vadd.f32 %v1289_v10, %v4801_v53  ;;  %v4839_v32 = vadd.f32 %v834_v55, %v4717_v23  ;;  %v4848_v6 = vadd.f32 %v836_v58, %v4721_v59  ;;  %v5721_v58 = vld [vmem:[#allocation12_spill] sm:$0xff] }
 0x13d   :  { %v1311_v18 = vmul.f32 %v4814_v40, %v4814_v40  ;;  %v4825_v33 = vadd.f32 %v1161_v30, %v772_v34  ;;  %v1278_v48 = vadd.f32 %v1277_v37, %v4814_v40  ;;  %v1332_v34 = vadd.f32 %v1331_v45, %v1310_v7  ;;  %v838_v3 = vpop.f32.mrf.mxu1  ;;  %v5719_v37 = vld [vmem:[#allocation10_spill] sm:$0xff] }
 0x13e   :  { %v1163_v47 = vpop.f32.mrf.mxu0  ;;  %v839_v41 = vadd.f32 %v838_v3, %v5717_v15 }
 0x13f   :  { %v1312_v35 = vmul.f32 %v4825_v33, %v4825_v33  ;;  %v4836_v56 = vadd.f32 %v1163_v47, %v774_v39  ;;  %v1320_v60 = vadd.f32 %v1319_v46, %v1311_v18  ;;  %v1291_v57 = vadd.f32 %v1290_v11, %v4825_v33  ;;  %v842_v22 = vpop.f32.mrf.mxu1  ;;  %v5720_v11 = vld [vmem:[#allocation11_spill] sm:$0xff] }
 0x140   :  { %v1165_v62 = vpop.f32.mrf.mxu0  ;;  %v843_v43 = vadd.f32 %v842_v22, %v5718_v19 }
 0x141   :  { %v1279_v61 = vadd.f32 %v1278_v48, %v4836_v56  ;;  %v1313_v36 = vmul.f32 %v4836_v56, %v4836_v56  ;;  %v4845_v38 = vadd.f32 %v1165_v62, %v776_v29  ;;  %v1333_v5 = vadd.f32 %v1332_v34, %v1312_v35  ;;  %v844_v7 = vpop.f32.mrf.mxu1 }
 0x142   :  { %v845_v18 = vadd.f32 %v844_v7, %v5719_v37 }
 0x143   :  { %v1280_v25 = vrot.slane %v1279_v61, 4  ;;  %v1321_v12 = vadd.f32 %v1320_v60, %v1313_v36  ;;  %v1292_v23 = vadd.f32 %v1291_v57, %v4845_v38  ;;  %v1314_v2 = vmul.f32 %v4845_v38, %v4845_v38  ;;  %v846_v29 = vpop.f32.mrf.mxu1 }
 0x144   :  { %v847_v48 = vadd.f32 %v846_v29, %v5720_v11 }
 0x145   :  { %v1281_v50 = vadd.f32 %v1280_v25, %v1279_v61  ;;  %v1322_v39 = vrot.slane %v1321_v12, 4  ;;  %v1293_v26 = vrot.slane %v1292_v23, 4  ;;  %v1334_v27 = vadd.f32 %v1333_v5, %v1314_v2  ;;  %v848_v35 = vpop.f32.mrf.mxu1 }
 0x146   :  { %v4858_v57 = vadd.f32 %v848_v35, %v5721_v58 }
 0x147   :  { %v1282_v59 = vrot.slane %v1281_v50, 2  ;;  %v1323_v30 = vadd.f32 %v1322_v39, %v1321_v12  ;;  %v1294_v52 = vadd.f32 %v1293_v26, %v1292_v23  ;;  %v1335_v10 = vrot.slane %v1334_v27, 4  ;;  %v1202_v61 = vpop.f32.mrf.mxu1 }
 0x148   :  { %v4861_v12 = vadd.f32 %v1202_v61, %v4735_v17  ;;  %v3859_v61 = vld [vmem:[%s5680_s2 + $0x60] ss:$8 sps:$4 sm:$0xff]  }
 0x149   :  { %v1324_v45 = vrot.slane %v1323_v30, 2  ;;  %v1295_v46 = vrot.slane %v1294_v52, 2  ;;  %v1336_v47 = vadd.f32 %v1335_v10, %v1334_v27  ;;  %v1283_v55 = vadd.f32 %v1282_v59, %v1281_v50  ;;  %v1204_v23 = vpop.f32.mrf.mxu1 }
 0x14a   :  { %v4864_v15 = vadd.f32 %v1204_v23, %v4743_v20  ;;  %v3868_v23 = vld [vmem:[%s5680_s2 + $0x40] ss:$8 sps:$4 sm:$0xff]  }
 0x14b   :  { %v1325_v34 = vadd.f32 %v1324_v45, %v1323_v30  ;;  %v1296_v60 = vadd.f32 %v1295_v46, %v1294_v52  ;;  %v1337_v62 = vrot.slane %v1336_v47, 2  ;;  %v1284_v25 = vrot.slane %v1283_v55, 1  ;;  %v1206_v50 = vpop.f32.mrf.mxu1 }
 0x14c   :  { %v4867_v27 = vadd.f32 %v1206_v50, %v4756_v8  ;;  %v3882_v50 = vld [vmem:[%s5680_s2 + $0x24] ss:$8 sps:$4 sm:$0xff]  }
 0x14d   :  { %v1297_v36 = vrot.slane %v1296_v60, 1  ;;  %v1338_v5 = vadd.f32 %v1337_v62, %v1336_v47  ;;  %v1326_v3 = vrot.slane %v1325_v34, 1  ;;  %v1285_v19 = vadd.f32 %v1284_v25, %v1283_v55  ;;  %v1208_v7 = vpop.f32.mrf.mxu1  ;;  %v3870_v25 = vld [vmem:[%s5680_s2 + $0x44] ss:$8 sps:$4 sm:$0xff]  }
 0x14e   :  { %v4871_v30 = vadd.f32 %v1208_v7, %v4771_v13  ;;  %v3894_v7 = vld [vmem:[%s5680_s2 + $0x4] ss:$8 sps:$4 sm:$0xff]  }
 0x14f   :  { %v1339_v2 = vrot.slane %v1338_v5, 1  ;;  %v1327_v22 = vadd.f32 %v1326_v3, %v1325_v34  ;;  %v1298_v39 = vadd.f32 %v1297_v36, %v1296_v60  ;;  %v1212_v52 = vpop.f32.mrf.mxu1  ;;  %v3864_v36 = vld [vmem:[%s5680_s2 + $0x54] ss:$8 sps:$4 sm:$0xff]   ;;  %v3862_v3 = vld [vmem:[%s5680_s2 + $0x50] ss:$8 sps:$4 sm:$0xff]  }
 0x150   :  { %v4875_v20 = vadd.f32 %v1212_v52, %v4785_v54  ;;  %v3898_v52 = vld [vmem:[%s5680_s2 + $0xf0] ss:$8 sps:$4 sm:$0xff]  }
 0x151   :  { %v1340_v26 = vadd.f32 %v1339_v2, %v1338_v5  ;;  %v1342_v17 = vsel %vm1341_vm6, %v1285_v19, %v1327_v22  ;;  %v1214_v10 = vpop.f32.mrf.mxu1  ;;  %v3867_v5 = vld [vmem:[%s5680_s2 + $0x174] ss:$8 sps:$4 sm:$0xff]   ;;  %v3874_v22 = vld [vmem:[%s5680_s2 + $0x30] ss:$8 sps:$4 sm:$0xff]  }
 0x152   :  { %v4878_v37 = vadd.f32 %v1214_v10, %v4797_v9  ;;  %v3876_v2 = vld [vmem:[%s5680_s2 + $0x34] ss:$8 sps:$4 sm:$0xff]   ;;  %v3886_v19 = vld [vmem:[%s5680_s2 + $0x10] ss:$8 sps:$4 sm:$0xff]  }
 0x153   :  { %v1343_v59 = vsel %vm1341_vm6, %v1298_v39, %v1340_v26  ;;  %v1216_v8 = vpop.f32.mrf.mxu1  ;;  %v3880_v39 = vld [vmem:[%s5680_s2 + $0x20] ss:$8 sps:$4 sm:$0xff]   ;;  %v3888_v26 = vld [vmem:[%s5680_s2 + $0x14] ss:$8 sps:$4 sm:$0xff]  }
 0x154   :  { %1440 = vmatprep.mubr.f32.mxu1 %v1343_v59  ;;  %v4881_v29 = vadd.f32 %v1216_v8, %v4808_v24  ;;  %v3892_v59 = vld [vmem:[%s5680_s2] ss:$8 sps:$4 sm:$0xff]  }
 0x155   :  { %1441 = vmatmul.mubr.f32.vlgmr.msra.gmra.mxu1 %v1342_v17  ;;  %v1218_v45 = vpop.f32.mrf.mxu1  ;;  %v3900_v17 = vld [vmem:[%s5680_s2 + $0xf4] ss:$8 sps:$4 sm:$0xff]  }
 0x156   :  { %v4884_v13 = vadd.f32 %v1218_v45, %v4819_v31 }
 0x157   :  { %v1222_v46 = vpop.f32.mrf.mxu1 }
 0x158   :  { %v4887_v47 = vadd.f32 %v1222_v46, %v4830_v49 }
 0x159   :  { %v1224_v55 = vpop.f32.mrf.mxu1 }
 0x15a   :  { %v4890_v54 = vadd.f32 %v1224_v55, %v4839_v32  ;;  %v1485_v32 = vld [vmem:[%s5679_s4 + $0x8] sm:$0xff] }
 0x15b   :  { %v1226_v11 = vpop.f32.mrf.mxu1  ;;  %1520 = vmatprep.subr.mxu1 %v1485_v32  ;;  %v4006_v32 = vmov 1966171168  }
 0x15c   :  { %v4893_v9 = vadd.f32 %v1226_v11, %v4848_v6  ;;  %v1484_v6 = vld [vmem:[%s5679_s4] sm:$0xff] }
 0x15d   :  { %v1228_v35 = vpop.f32.mrf.mxu1  ;;  %1521 = vmatpush1.msra.mxu1 %v1484_v6  ;;  %v1458_v6 = vunpack.c.l.s4 %v4006_v32  ;;  %v3901_v32 = vld [vmem:[%s5680_s2 + $0x110] ss:$8 sps:$4 sm:$0xff]  }
 0x15e   :  { %v4895_v34 = vadd.f32 %v1228_v35, %v839_v41  ;;  %v5696_v41 = vmov 0.0   ;;  %2446 = vmatprep.subr.bf16.mxu1 %v3867_v5 }
 0x15f   :  { %v1232_v24 = vpop.f32.mrf.mxu1  ;;  %1554 = vmatprep.mubr.f32.mxu1 %v5696_v41 }
 0x160   :  { %v4897_v60 = vadd.f32 %v1232_v24, %v843_v43  ;;  %v3856_v43 = vld [vmem:[%s5680_s2 + $0x70] ss:$8 sps:$4 sm:$0xff]  }
 0x161   :  { %v1234_v31 = vpop.f32.mrf.mxu1 }
 0x162   :  { %v4899_v62 = vadd.f32 %v1234_v31, %v845_v18  ;;  %v3858_v18 = vld [vmem:[%s5680_s2 + $0x74] ss:$8 sps:$4 sm:$0xff]  }
 0x163   :  { %v1236_v58 = vpop.f32.mrf.mxu1  ;;  %2034 = vmatprep.subr.bf16.mxu0 %v3858_v18  ;;  %v1459_v18 = vunpack.c.0.s8 %v1458_v6  ;;  %v3906_v6 = vld [vmem:[%s5680_s2 + $0xe4] ss:$8 sps:$4 sm:$0xff]  }
 0x164   :  { %v4901_v49 = vadd.f32 %v1236_v58, %v847_v48  ;;  %v3861_v48 = vld [vmem:[%s5680_s2 + $0x64] ss:$8 sps:$4 sm:$0xff]   ;;  %2035 = vmatpush1.bf16.msra.mxu0 %v3856_v43  ;;  %v1460_v43 = vlaneseq }
 0x165   :  { %2036 = vmatprep.subr.bf16.mxu0 %v3861_v48  ;;  %v4967_v10 = vpop.f32.mrf.mxu1 }
 0x166   :  { %v4969_v48 = vshrl.u32 %v1460_v43, 7  ;;  %v3904_v43 = vld [vmem:[%s5680_s2 + $0xe0] ss:$8 sps:$4 sm:$0xff]  }
 0x168   :  { %2037 = vmatpush1.bf16.msra.mxu0 %v3859_v61  ;;  %v4972_v61 = vsub.s32 %v1459_v18, %v4969_v48  ;;  %v3909_v18 = vld [vmem:[%s5680_s2 + $0x104] ss:$8 sps:$4 sm:$0xff]  }
 0x169   :  { %2038 = vmatprep.subr.bf16.mxu0 %v3864_v36 }
 0x16c   :  { %2039 = vmatpush1.bf16.msra.mxu0 %v3862_v3 }
 0x16d   :  { %2040 = vmatprep.subr.bf16.mxu0 %v3870_v25  ;;  %v1453_v25 = vld [vmem:[%s5681_s5] sm:$0x1] }
 0x170   :  { %2041 = vmatpush1.bf16.msra.mxu0 %v3868_v23 }
 0x171   :  { %2042 = vmatprep.subr.bf16.mxu0 %v3876_v2 }
 0x174   :  { %2043 = vmatpush1.bf16.msra.mxu0 %v3874_v22  ;;  %v1474_v22 = vld [vmem:[%s5682_s6] sm:$0x1] }
 0x175   :  { %2044 = vmatprep.subr.bf16.mxu0 %v3882_v50 }
 0x178   :  { %2045 = vmatpush1.bf16.msra.mxu0 %v3880_v39  ;;  %v4983_v39 = vsub.s32 0, %v4969_v48 }
 0x179   :  { %2046 = vmatprep.subr.bf16.mxu0 %v3888_v26 }
 0x17c   :  { %2047 = vmatpush1.bf16.msra.mxu0 %v3886_v19 }
 0x17d   :  { %2048 = vmatprep.subr.bf16.mxu0 %v3894_v7  ;;  %v3865_v7 = vld [vmem:[%s5680_s2 + $0x170] ss:$8 sps:$4 sm:$0xff]  }
 0x180   :  { %2049 = vmatpush1.bf16.msra.mxu0 %v3892_v59  ;;  %v3873_v59 = vld [vmem:[%s5680_s2 + $0x164] ss:$8 sps:$4 sm:$0xff]  }
 0x181   :  { %2050 = vmatprep.subr.bf16.mxu0 %v3900_v17 }
 0x184   :  { %2051 = vmatpush2.bf16.msra.mxu0 %v3898_v52  ;;  %v3871_v52 = vld [vmem:[%s5680_s2 + $0x160] ss:$8 sps:$4 sm:$0xff]  }
 0x185   :  { %2052 = vmatprep.subr.bf16.mxu0 %v3906_v6  ;;  %v3943_v6 = vld [vmem:[%s5680_s2 + $0x1a0] ss:$8 sps:$4 sm:$0xff]  }
 0x188   :  { %2053 = vmatpush2.bf16.msra.mxu0 %v3904_v43  ;;  %v3948_v43 = vld [vmem:[%s5680_s2 + $0x274] ss:$8 sps:$4 sm:$0xff]  }
 0x215   :  { %v3667_v8 = vpop.f32.mrf.mxu1 }
 0x217   :  { %v3668_v45 = vpop.f32.mrf.mxu1 }
 0x218   :  { %v3669_v46 = vadd.f32 %v3668_v45, %v3667_v8  ;;  %v3879_v8 = vld [vmem:[%s5680_s2 + $0x154] ss:$8 sps:$4 sm:$0xff]   ;;  %v3877_v45 = vld [vmem:[%s5680_s2 + $0x150] ss:$8 sps:$4 sm:$0xff]  }
 0x21a   :  { %v1446_v55 = vmul.f32 0.00048828125, %v3669_v46  ;;  %v3885_v46 = vld [vmem:[%s5680_s2 + $0x144] ss:$8 sps:$4 sm:$0xff]  }
 0x21c   :  { %v1447_v11 = vmul.f32 %v1446_v55, %v1446_v55 }
 0x21e   :  { %v1449_v35 = vrot.slane %v1447_v11, 7  ;;  %v3891_v11 = vld [vmem:[%s5680_s2 + $0x134] ss:$8 sps:$4 sm:$0xff]  }
 0x220   :  { %v1451_v24 = vsub.f32 %v1446_v55, %v1449_v35  ;;  %v3889_v35 = vld [vmem:[%s5680_s2 + $0x130] ss:$8 sps:$4 sm:$0xff]  }
 0x222   :  { %v1452_v31 = vmax.f32 %v1451_v24, 0.0  ;;  %v3897_v24 = vld [vmem:[%s5680_s2 + $0x124] ss:$8 sps:$4 sm:$0xff]  }
 0x224   :  { %v1454_v58 = vadd.f32 1e-05, %v1452_v31  ;;  %v3895_v31 = vld [vmem:[%s5680_s2 + $0x120] ss:$8 sps:$4 sm:$0xff]  }
 0x226   :  { %4000 = vrsqrt.f32 %v1454_v58  ;;  %v3903_v58 = vld [vmem:[%s5680_s2 + $0x114] ss:$8 sps:$4 sm:$0xff]  }
 0x233   :  { %v4001_v36 = vpop.eup %4000 }
 0x234   :  { %v1463_v5 = vrot.slane %v4001_v36, %v4972_v61  ;;  %v3907_v36 = vld [vmem:[%s5680_s2 + $0x100] ss:$8 sps:$4 sm:$0xff]  }
 0x236   :  { %v1464_v3 = vcombine.high %v1463_v5, %v1463_v5  ;;  %v3912_v5 = vld [vmem:[%s5680_s2 + $0xd4] ss:$8 sps:$4 sm:$0xff]  }
 0x237   :  { %2054 = vmatprep.subr.bf16.mxu0 %v3912_v5  ;;  %v3957_v5 = vld [vmem:[%s5680_s2 + $0x184] ss:$8 sps:$4 sm:$0xff]  }
 0x238   :  { %v1471_v23 = vrot.slane %v1464_v3, %v4972_v61  ;;  %v3910_v3 = vld [vmem:[%s5680_s2 + $0xd0] ss:$8 sps:$4 sm:$0xff]  }
 0x239   :  { %2055 = vmatpush2.bf16.msra.mxu0 %v3910_v3  ;;  %v3955_v3 = vld [vmem:[%s5680_s2 + $0x180] ss:$8 sps:$4 sm:$0xff]  }
 0x23a   :  { %v1473_v2 = vmul.f32 %v1471_v23, %v1453_v25  ;;  %v3915_v25 = vld [vmem:[%s5680_s2 + $0x1f4] ss:$8 sps:$4 sm:$0xff]   ;;  %v3913_v23 = vld [vmem:[%s5680_s2 + $0x1f0] ss:$8 sps:$4 sm:$0xff]  }
 0x23c   :  { %v1475_v50 = vmul.f32 %v1473_v2, %v1446_v55  ;;  %v3883_v55 = vld [vmem:[%s5680_s2 + $0x140] ss:$8 sps:$4 sm:$0xff]  }
 0x23e   :  { %v1476_v26 = vsub.f32 %v1474_v22, %v1475_v50  ;;  %v3916_v22 = vld [vmem:[%s5680_s2 + $0xc0] ss:$8 sps:$4 sm:$0xff]   ;;  %v3921_v50 = vld [vmem:[%s5680_s2 + $0x1e4] ss:$8 sps:$4 sm:$0xff]  }
 0x240   :  { %v1481_v19 = vrot.slane %v1476_v26, %v4983_v39  ;;  %v3919_v26 = vld [vmem:[%s5680_s2 + $0x1e0] ss:$8 sps:$4 sm:$0xff]  }
 0x242   :  { %v1483_v17 = vsel %vm1341_vm6, %v1473_v2, %v1481_v19  ;;  %v3918_v2 = vld [vmem:[%s5680_s2 + $0xc4] ss:$8 sps:$4 sm:$0xff]   ;;  %v3924_v19 = vld [vmem:[%s5680_s2 + $0xb4] ss:$8 sps:$4 sm:$0xff]  }
 0x243   :  { %3431 = vmatmul.mubr.msk.f32.vlgmr.msra.gmra.mxu1 %vm1486_vm11, %v1483_v17  ;;  %2056 = vmatprep.subr.bf16.mxu0 %v3918_v2  ;;  %v3925_v17 = vld [vmem:[%s5680_s2 + $0x1d0] ss:$8 sps:$4 sm:$0xff]  }
 0x244   :  { %2447 = vmatpush1.bf16.msra.mxu1 %v3865_v7  ;;  %2057 = vmatpush2.bf16.msra.mxu0 %v3916_v22  ;;  %v3922_v7 = vld [vmem:[%s5680_s2 + $0xb0] ss:$8 sps:$4 sm:$0xff]  }
 0x245   :  { %2448 = vmatprep.subr.bf16.mxu1 %v3873_v59  ;;  %2058 = vmatprep.subr.bf16.mxu0 %v3924_v19  ;;  %v3927_v59 = vld [vmem:[%s5680_s2 + $0x1d4] ss:$8 sps:$4 sm:$0xff]  }
 0x248   :  { %2449 = vmatpush1.bf16.msra.mxu1 %v3871_v52  ;;  %2059 = vmatpush2.bf16.msra.mxu0 %v3922_v7  ;;  %v3930_v52 = vld [vmem:[%s5680_s2 + $0xa4] ss:$8 sps:$4 sm:$0xff]  }
 0x249   :  { %2450 = vmatprep.subr.bf16.mxu1 %v3879_v8  ;;  %v3928_v8 = vld [vmem:[%s5680_s2 + $0xa0] ss:$8 sps:$4 sm:$0xff]   ;;  %2060 = vmatprep.subr.bf16.mxu0 %v3930_v52 }
 0x24c   :  { %2451 = vmatpush1.bf16.msra.mxu1 %v3877_v45  ;;  %v3933_v45 = vld [vmem:[%s5680_s2 + $0x1c4] ss:$8 sps:$4 sm:$0xff]   ;;  %2061 = vmatpush2.bf16.msra.mxu0 %v3928_v8 }
 0x24d   :  { %2452 = vmatprep.subr.bf16.mxu1 %v3885_v46  ;;  %v3931_v46 = vld [vmem:[%s5680_s2 + $0x1c0] ss:$8 sps:$4 sm:$0xff]  }
 0x250   :  { %2453 = vmatpush1.bf16.msra.mxu1 %v3883_v55  ;;  %v3936_v55 = vld [vmem:[%s5680_s2 + $0x94] ss:$8 sps:$4 sm:$0xff]  }
 0x251   :  { %2454 = vmatprep.subr.bf16.mxu1 %v3891_v11  ;;  %v3934_v11 = vld [vmem:[%s5680_s2 + $0x90] ss:$8 sps:$4 sm:$0xff]   ;;  %2062 = vmatprep.subr.bf16.mxu0 %v3936_v55 }
 0x252   :  { %2063 = vmatpush2.bf16.msra.mxu0 %v3934_v11 }
 0x254   :  { %2455 = vmatpush1.bf16.msra.mxu1 %v3889_v35  ;;  %v3939_v35 = vld [vmem:[%s5680_s2 + $0x1b4] ss:$8 sps:$4 sm:$0xff]  }
 0x255   :  { %2456 = vmatprep.subr.bf16.mxu1 %v3897_v24  ;;  %v3937_v24 = vld [vmem:[%s5680_s2 + $0x1b0] ss:$8 sps:$4 sm:$0xff]  }
 0x258   :  { %2457 = vmatpush1.bf16.msra.mxu1 %v3895_v31  ;;  %v3942_v31 = vld [vmem:[%s5680_s2 + $0x84] ss:$8 sps:$4 sm:$0xff]  }
 0x259   :  { %2458 = vmatprep.subr.bf16.mxu1 %v3903_v58  ;;  %v3940_v58 = vld [vmem:[%s5680_s2 + $0x80] ss:$8 sps:$4 sm:$0xff]   ;;  %2064 = vmatprep.subr.bf16.mxu0 %v3942_v31 }
 0x25a   :  { %2065 = vmatpush2.bf16.msra.mxu0 %v3940_v58 }
 0x25b   :  { %2798 = vmatprep.subr.bf16.mxu0 %v3948_v43 }
 0x25c   :  { %2459 = vmatpush1.bf16.msra.mxu1 %v3901_v32  ;;  %v3945_v32 = vld [vmem:[%s5680_s2 + $0x1a4] ss:$8 sps:$4 sm:$0xff]  }
 0x25d   :  { %2460 = vmatprep.subr.bf16.mxu1 %v3909_v18  ;;  %v3949_v18 = vld [vmem:[%s5680_s2 + $0x190] ss:$8 sps:$4 sm:$0xff]  }
 0x260   :  { %2461 = vmatpush1.bf16.msra.mxu1 %v3907_v36  ;;  %v3951_v36 = vld [vmem:[%s5680_s2 + $0x194] ss:$8 sps:$4 sm:$0xff]  }
 0x261   :  { %2462 = vmatprep.subr.bf16.mxu1 %v3915_v25  ;;  %v5127_v25 = vsub.s32 1, %v4969_v48 }
 0x264   :  { %2463 = vmatpush2.bf16.msra.mxu1 %v3913_v23 }
 0x265   :  { %2464 = vmatprep.subr.bf16.mxu1 %v3921_v50 }
 0x268   :  { %2465 = vmatpush2.bf16.msra.mxu1 %v3919_v26 }
 0x269   :  { %2466 = vmatprep.subr.bf16.mxu1 %v3927_v59 }
 0x26c   :  { %2467 = vmatpush2.bf16.msra.mxu1 %v3925_v17 }
 0x26d   :  { %2468 = vmatprep.subr.bf16.mxu1 %v3933_v45 }
 0x270   :  { %2469 = vmatpush2.bf16.msra.mxu1 %v3931_v46 }
 0x271   :  { %2470 = vmatprep.subr.bf16.mxu1 %v3939_v35 }
 0x274   :  { %2471 = vmatpush2.bf16.msra.mxu1 %v3937_v24 }
 0x275   :  { %2472 = vmatprep.subr.bf16.mxu1 %v3945_v32 }
 0x278   :  { %2473 = vmatpush2.bf16.msra.mxu1 %v3943_v6 }
 0x279   :  { %2474 = vmatprep.subr.bf16.mxu1 %v3951_v36 }
 0x27c   :  { %2475 = vmatpush2.bf16.msra.mxu1 %v3949_v18 }
 0x27d   :  { %2476 = vmatprep.subr.bf16.mxu1 %v3957_v5 }
 0x280   :  { %2477 = vmatpush2.bf16.msra.mxu1 %v3955_v3 }
 0x303   :  { %v1556_v23 = vpop.f32.mrf.mxu1 }
 0x304   :  { %v1564_v2 = vrot.slane %v1556_v23, %v4983_v39  ;;  %v1588_v22 = vrot.slane %v1556_v23, %v5127_v25 }
 0x305   :  { %v1558_v24 = vpop.f32.mrf.mxu1 }
 0x306   :  { %v1569_v50 = vmul.f32 %v1564_v2, %v4737_v63  ;;  %v1571_v26 = vmul.f32 %v1564_v2, %v4733_v14  ;;  %v1573_v19 = vmul.f32 %v1564_v2, %v4741_v21  ;;  %v1575_v7 = vmul.f32 %v1564_v2, %v4754_v28 }
 0x307   :  { %v1577_v59 = vmul.f32 %v1564_v2, %v4768_v44  ;;  %v1579_v17 = vmul.f32 %v1564_v2, %v4790_v0  ;;  %v1581_v48 = vmul.f32 %v1564_v2, %v4814_v40  ;;  %v1583_v52 = vmul.f32 %v1564_v2, %v4836_v56 }
 0x308   :  { %v1593_v8 = vadd.f32 %v1588_v22, %v1569_v50  ;;  %v1595_v45 = vadd.f32 %v1588_v22, %v1571_v26  ;;  %v1597_v46 = vadd.f32 %v1588_v22, %v1573_v19  ;;  %v1599_v55 = vadd.f32 %v1588_v22, %v1575_v7 }
 0x309   :  { %v1601_v11 = vadd.f32 %v1588_v22, %v1577_v59  ;;  %v1603_v63 = vadd.f32 %v1588_v22, %v1579_v17  ;;  %v1605_v35 = vadd.f32 %v1588_v22, %v1581_v48  ;;  %v1607_v14 = vadd.f32 %v1588_v22, %v1583_v52 }
 0x30a   :  { %v1609_v21 = vmax.f32 %v1593_v8, 0.0  ;;  %v1611_v31 = vmax.f32 %v1595_v45, 0.0  ;;  %v1613_v28 = vmax.f32 %v1597_v46, 0.0  ;;  %v1615_v58 = vmax.f32 %v1599_v55, 0.0 }
 0x30b   :  { %v1617_v44 = vmax.f32 %v1601_v11, 0.0  ;;  %v1568_v0 = vrot.slane %v1558_v24, %v4983_v39  ;;  %v1619_v32 = vmax.f32 %v1603_v63, 0.0  ;;  %v1621_v40 = vmax.f32 %v1605_v35, 0.0 }
 0x30c   :  { %v1623_v6 = vmax.f32 %v1607_v14, 0.0  ;;  %v1592_v56 = vrot.slane %v1558_v24, %v5127_v25 }
 0x30d   :  { %v1570_v43 = vmul.f32 %v1568_v0, %v4747_v42  ;;  %v1572_v18 = vmul.f32 %v1568_v0, %v4739_v4  ;;  %v1574_v36 = vmul.f32 %v1568_v0, %v4749_v16  ;;  %v1576_v5 = vmul.f32 %v1568_v0, %v4766_v1 }
 0x30e   :  { %v1578_v3 = vmul.f32 %v1568_v0, %v4782_v51  ;;  %v1580_v23 = vmul.f32 %v1568_v0, %v4801_v53  ;;  %v1582_v2 = vmul.f32 %v1568_v0, %v4825_v33  ;;  %v1584_v22 = vmul.f32 %v1568_v0, %v4845_v38 }
 0x30f   :  { %v1594_v50 = vadd.f32 %v1592_v56, %v1570_v43  ;;  %v1596_v26 = vadd.f32 %v1592_v56, %v1572_v18  ;;  %v1598_v19 = vadd.f32 %v1592_v56, %v1574_v36  ;;  %v1600_v7 = vadd.f32 %v1592_v56, %v1576_v5 }
 0x310   :  { %v1602_v59 = vadd.f32 %v1592_v56, %v1578_v3  ;;  %v1604_v42 = vadd.f32 %v1592_v56, %v1580_v23  ;;  %v1606_v17 = vadd.f32 %v1592_v56, %v1582_v2  ;;  %v1608_v4 = vadd.f32 %v1592_v56, %v1584_v22 }
 0x311   :  { %v1610_v48 = vmax.f32 %v1594_v50, 0.0  ;;  %v1612_v16 = vmax.f32 %v1596_v26, 0.0  ;;  %v1614_v52 = vmax.f32 %v1598_v19, 0.0  ;;  %v1616_v1 = vmax.f32 %v1600_v7, 0.0  ;;  %v1782_v26 = vld [vmem:[#allocation2 + $0x48] sm:$0x11] }
 0x312   :  { %v1618_v8 = vmax.f32 %v1602_v59, 0.0  ;;  %v1620_v51 = vmax.f32 %v1604_v42, 0.0  ;;  %v1622_v45 = vmax.f32 %v1606_v17, 0.0  ;;  %v1624_v53 = vmax.f32 %v1608_v4, 0.0 }
 0x313   :  { %v3627_v46 = vpack.c.bf16 %v1610_v48, %v1609_v21  ;;  %v3628_v33 = vpack.c.bf16 %v1612_v16, %v1611_v31  ;;  %v3629_v55 = vpack.c.bf16 %v1614_v52, %v1613_v28  ;;  %v3630_v38 = vpack.c.bf16 %v1616_v1, %v1615_v58  ;;  %v1776_v52 = vld [vmem:[#allocation2 + $0x18] sm:$0xff] }
 0x314   :  { %v3631_v11 = vpack.c.bf16 %v1618_v8, %v1617_v44  ;;  %v3632_v63 = vpack.c.bf16 %v1620_v51, %v1619_v32  ;;  %v3633_v35 = vpack.c.bf16 %v1622_v45, %v1621_v40  ;;  %v3634_v14 = vpack.c.bf16 %v1624_v53, %v1623_v6 }
 0x315   :  { %v1692_v24 = vshrl.u32 %v3627_v46, 16  ;;  %v1695_v0 = vshll.u32 %v3627_v46, 16  ;;  %v1700_v56 = vshrl.u32 %v3628_v33, 16  ;;  %v1703_v43 = vshll.u32 %v3628_v33, 16 }
 0x316   :  { %v1709_v18 = vshrl.u32 %v3629_v55, 16  ;;  %v1712_v36 = vshll.u32 %v3629_v55, 16  ;;  %v1718_v5 = vshrl.u32 %v3630_v38, 16  ;;  %v1721_v2 = vshll.u32 %v3630_v38, 16 }
 0x317   :  { %v1694_v3 = vrot.slane %v1692_v24, 7  ;;  %v1702_v23 = vrot.slane %v1700_v56, 7  ;;  %v1727_v22 = vshrl.u32 %v3631_v11, 16  ;;  %v1730_v28 = vshll.u32 %v3631_v11, 16 }
 0x318   :  { %v1711_v21 = vrot.slane %v1709_v18, 7  ;;  %v1720_v31 = vrot.slane %v1718_v5, 7  ;;  %v1735_v58 = vshrl.u32 %v3632_v63, 16  ;;  %v1738_v50 = vshll.u32 %v3632_v63, 16 }
 0x319   :  { %v1697_v32 = vor.u32 %v1695_v0, %v1694_v3  ;;  %v1698_v40 = vrot.slane %v1694_v3, 4  ;;  %v1705_v6 = vor.u32 %v1703_v43, %v1702_v23  ;;  %v1707_v19 = vrot.slane %v1702_v23, 4  ;;  %v1791_v43 = vld [vmem:[#allocation2 + $0x20] sm:$0x11] }
 0x31a   :  { %v1714_v7 = vor.u32 %v1712_v36, %v1711_v21  ;;  %v1716_v59 = vrot.slane %v1711_v21, 4  ;;  %v1725_v42 = vrot.slane %v1720_v31, 4  ;;  %v1723_v17 = vor.u32 %v1721_v2, %v1720_v31  ;;  %v3946_v36 = vld [vmem:[%s5680_s2 + $0x270] ss:$8 sps:$4 sm:$0xff]   ;;  %v3954_v31 = vld [vmem:[%s5680_s2 + $0x264] ss:$8 sps:$4 sm:$0xff]  }
 0x31b   :  { %v1729_v4 = vrot.slane %v1727_v22, 7  ;;  %v5155_v48 = vrot.slane %v1735_v58, 7  ;;  %v1744_v16 = vshrl.u32 %v3633_v35, 16  ;;  %v1747_v1 = vshll.u32 %v3633_v35, 16 }
 0x31c   :  { %v1753_v8 = vshrl.u32 %v3634_v14, 16  ;;  %v1783_v45 = vsel %vm4661_vm14, %v1725_v42, %v1782_v26  ;;  %v5161_v53 = vsel %vm5151_vm13, %v1698_v40, %v1705_v6  ;;  %v1756_v38 = vshll.u32 %v3634_v14, 16  ;;  %v3960_v42 = vld [vmem:[%s5680_s2 + $0x254] ss:$8 sps:$4 sm:$0xff]  }
 0x31d   :  { %v1732_v46 = vor.u32 %v1730_v28, %v1729_v4  ;;  %v1733_v33 = vrot.slane %v1729_v4, 4  ;;  %v1740_v55 = vor.u32 %v1738_v50, %v5155_v48  ;;  %1784 = vst [vmem:[#allocation2 + $0x48] sm:$0x11] %v1783_v45  ;;  %v5164_v11 = vrot.slane %v1744_v16, 7  ;;  %v1785_v28 = vld [vmem:[#allocation2] sm:$0xff] }
 0x31e   :  { %v1755_v63 = vrot.slane %v1753_v8, 7  ;;  %v1777_v0 = vsel %vm1775_vm8, %v1697_v32, %v1776_v52  ;;  %v5173_v56 = vsel %vm5151_vm13, %v1707_v19, %v1714_v7  ;;  %v5182_v5 = vsel %vm5151_vm13, %v1716_v59, %v1723_v17  ;;  %v3952_v59 = vld [vmem:[%s5680_s2 + $0x260] ss:$8 sps:$4 sm:$0xff]  }
 0x31f   :  { %1778 = vst [vmem:[#allocation2 + $0x18] sm:$0xff] %v1777_v0  ;;  %v3440_v18 = vcombine.low %v1777_v0, %v5161_v53  ;;  %v3441_v14 = vcombine.high %v1777_v0, %v5161_v53  ;;  %v2134_v3 = vshrl.u32 %v1777_v0, 16  ;;  %v1742_v23 = vrot.slane %v5155_v48, 4 }
 0x320   :  { %v1749_v2 = vor.u32 %v1747_v1, %v5164_v11  ;;  %v1751_v22 = vrot.slane %v5164_v11, 4  ;;  %v1760_v21 = vrot.slane %v1755_v63, 4  ;;  %v1758_v58 = vor.u32 %v1756_v38, %v1755_v63 }
 0x321   :  { %2066 = vmatprep.mubr.bf16.mxu0 %v3441_v14  ;;  %v3443_v32 = vcombine.high %v5173_v56, %v5182_v5  ;;  %v2136_v40 = vrot.slane %v2134_v3, 4  ;;  %v2137_v6 = vshll.u32 %v1777_v0, 16  ;;  %v2143_v26 = vshll.u32 %v5161_v53, 16  ;;  %v3958_v0 = vld [vmem:[%s5680_s2 + $0x250] ss:$8 sps:$4 sm:$0xff]  }
 0x322   :  { %v1792_v50 = vsel %vm4661_vm14, %v1760_v21, %v1791_v43  ;;  %2067 = vmatmul.mubr.bf16.vlgmr.msra.gmra.mxu0 %v3440_v18  ;;  %v2147_v19 = vshrl.u32 %v5161_v53, 16  ;;  %v2153_v7 = vshll.u32 %v5173_v56, 16  ;;  %v5205_v4 = vsel %vm5151_vm13, %v1733_v33, %v1740_v55 }
 0x323   :  { %1793 = vst [vmem:[#allocation2 + $0x20] sm:$0x11] %v1792_v50  ;;  %2799 = vmatpush1.bf16.msra.mxu0 %v3946_v36  ;;  %2076 = vmatprep.mubr.bf16.mxu0 %v3443_v32  ;;  %v2139_v17 = vrot.slane %v2137_v6, 5  ;;  %v5212_v48 = vsel %vm1775_vm8, %v1732_v46, %v1785_v28  ;;  %v2157_v16 = vshrl.u32 %v5173_v56, 16  ;;  %v2145_v52 = vrot.slane %v2143_v26, 5 }
 0x324   :  { %2800 = vmatprep.subr.bf16.mxu0 %v3954_v31  ;;  %v2149_v1 = vrot.slane %v2147_v19, 4  ;;  %v2155_v8 = vrot.slane %v2153_v7, 5  ;;  %1787 = vst [vmem:[#allocation2] sm:$0xff] %v5212_v48  ;;  %v3445_v51 = vcombine.high %v5212_v48, %v5205_v4  ;;  %v5218_v45 = vld [vmem:[#allocation2 + $0x48] sm:$0x11]  ;;  %v2163_v38 = vshll.u32 %v5182_v5, 16 }
 0x325   :  { %v2140_v33 = vor.u32 %v2139_v17, %v2136_v40  ;;  %v2159_v55 = vrot.slane %v2157_v16, 4  ;;  %v2167_v46 = vshrl.u32 %v5182_v5, 16  ;;  %v2173_v63 = vshll.u32 %v5218_v45, 16  ;;  %v3963_v31 = vld [vmem:[%s5680_s2 + $0x244] ss:$8 sps:$4 sm:$0xff]  }
 0x326   :  { %v2150_v11 = vor.u32 %v2149_v1, %v2145_v52  ;;  %v3444_v24 = vcombine.low %v5212_v48, %v5205_v4  ;;  %v5227_v35 = vsel %vm5151_vm13, %v1742_v23, %v1749_v2  ;;  %v2165_v14 = vrot.slane %v2163_v38, 5  ;;  %v3966_v17 = vld [vmem:[%s5680_s2 + $0x234] ss:$8 sps:$4 sm:$0xff]   ;;  %v3976_v28 = vld [vmem:[%s5680_s2 + $0x2f0] ss:$8 sps:$4 sm:$0xff]  }
 0x327   :  { %2801 = vmatpush1.bf16.msra.mxu0 %v3952_v59  ;;  %v2141_v43 = vrot.slane %v2140_v33, 4  ;;  %v2160_v18 = vor.u32 %v2159_v55, %v2155_v8  ;;  %v2169_v36 = vrot.slane %v2167_v46, 4  ;;  %v3442_v3 = vcombine.low %v5173_v56, %v5182_v5  ;;  %v3964_v55 = vld [vmem:[%s5680_s2 + $0x230] ss:$8 sps:$4 sm:$0xff]  }
 0x328   :  { %2802 = vmatprep.subr.bf16.mxu0 %v3960_v42  ;;  %v2151_v21 = vrot.slane %v2150_v11, 4  ;;  %v5239_v23 = vsel %vm5151_vm13, %v1751_v22, %v1758_v58  ;;  %v2178_v2 = vshrl.u32 %v5212_v48, 16  ;;  %v2175_v50 = vrot.slane %v2173_v63, 5  ;;  %v3961_v42 = vld [vmem:[%s5680_s2 + $0x240] ss:$8 sps:$4 sm:$0xff]  }
 0x329   :  { %v2146_v32 = vsel %vm4151_vm2, %v2141_v43, %v2145_v52  ;;  %v2161_v40 = vrot.slane %v2160_v18, 4  ;;  %v2170_v6 = vor.u32 %v2169_v36, %v2165_v14  ;;  %v2181_v7 = vshll.u32 %v5212_v48, 16  ;;  %v2535_v11 = vld [vmem:[#allocation2 + $0x18] sm:$0xee] }
 0x32a   :  { %2077 = vmatmul.mubr.bf16.gmra.mxu0 %v3442_v3  ;;  %v2156_v26 = vsel %vm4151_vm2, %v2151_v21, %v2155_v8  ;;  %v2180_v19 = vrot.slane %v2178_v2, 4  ;;  %v2187_v59 = vshll.u32 %v5205_v4, 16  ;;  %v2191_v48 = vshrl.u32 %v5205_v4, 16 }
 0x32b   :  { %v3512_v44 = vcombine.low %v2146_v32, %v2156_v26  ;;  %v3513_v22 = vcombine.high %v2146_v32, %v2156_v26  ;;  %2803 = vmatpush1.bf16.msra.mxu0 %v3958_v0  ;;  %2086 = vmatprep.mubr.bf16.mxu0 %v3445_v51  ;;  %v2171_v58 = vrot.slane %v2170_v6, 4  ;;  %v2183_v16 = vrot.slane %v2181_v7, 5  ;;  %v5264_v0 = vld [vmem:[#allocation2 + $0x20] sm:$0x11]  ;;  %v2536_v2 = vld [vmem:[#allocation2] sm:$0xee] }
 0x32c   :  { %2804 = vmatprep.subr.bf16.mxu0 %v3963_v31  ;;  %v2189_v52 = vrot.slane %v2187_v59, 5  ;;  %v2166_v1 = vsel %vm4151_vm2, %v2161_v40, %v2165_v14  ;;  %v2197_v51 = vshll.u32 %v5227_v35, 16  ;;  %v2193_v46 = vrot.slane %v2191_v48, 4  ;;  %v3969_v14 = vld [vmem:[%s5680_s2 + $0x224] ss:$8 sps:$4 sm:$0xff]  }
 0x32d   :  { %2478 = vmatprep.mubr.bf16.mxu1 %v3513_v22  ;;  %v2176_v8 = vsel %vm4151_vm2, %v2171_v58, %v2175_v50  ;;  %v2184_v38 = vor.u32 %v2183_v16, %v2180_v19  ;;  %v2549_v63 = vrot.slane %v5161_v53, 5  ;;  %v2201_v36 = vshrl.u32 %v5227_v35, 16  ;;  %v3967_v26 = vld [vmem:[%s5680_s2 + $0x220] ss:$8 sps:$4 sm:$0xff]   ;;  %v3972_v58 = vld [vmem:[%s5680_s2 + $0x214] ss:$8 sps:$4 sm:$0xff]  }
 0x32e   :  { %2479 = vmatmul.mubr.bf16.vlgmr.msra.gmra.mxu1 %v3512_v44  ;;  %v3515_v33 = vcombine.high %v2166_v1, %v2176_v8  ;;  %v2194_v18 = vor.u32 %v2193_v46, %v2189_v52  ;;  %v2207_v3 = vshll.u32 %v5239_v23, 16  ;;  %v3447_v21 = vcombine.high %v5227_v35, %v5239_v23  ;;  %v3970_v46 = vld [vmem:[%s5680_s2 + $0x210] ss:$8 sps:$4 sm:$0xff]  }
 0x32f   :  { %2805 = vmatpush1.bf16.msra.mxu0 %v3961_v42  ;;  %v2185_v43 = vrot.slane %v2184_v38, 4  ;;  %v2199_v31 = vrot.slane %v2197_v51, 5  ;;  %v2211_v53 = vshrl.u32 %v5239_v23, 16  ;;  %v3552_v6 = vrot.slane %v2535_v11, 9 }
 0x330   :  { %2488 = vmatprep.mubr.bf16.mxu1 %v3515_v33  ;;  %2806 = vmatprep.subr.bf16.mxu0 %v3966_v17  ;;  %v2195_v40 = vrot.slane %v2194_v18, 4  ;;  %v2217_v50 = vshll.u32 %v5264_v0, 16  ;;  %v2551_v19 = vrot.slane %v2549_v63, 4  ;;  %v2203_v7 = vrot.slane %v2201_v36, 4  ;;  %v2987_v33 = vld [vmem:[%s5678_s3 + $0xf0] sm:$0xff] }
 0x331   :  { %v2190_v32 = vsel %vm4151_vm2, %v2185_v43, %v2189_v52  ;;  %v2209_v59 = vrot.slane %v2207_v3, 5  ;;  %v2213_v44 = vrot.slane %v2211_v53, 4  ;;  %v3514_v22 = vcombine.low %v2166_v1, %v2176_v8 }
 0x332   :  { %2087 = vmatmul.mubr.bf16.gmra.mxu0 %v3444_v24  ;;  %v2200_v24 = vsel %vm4151_vm2, %v2195_v40, %v2199_v31  ;;  %v2552_v42 = vrot.slane %v5173_v56, 5  ;;  %v3553_v17 = vrot.slane %v2536_v2, 9  ;;  %v2204_v48 = vor.u32 %v2203_v7, %v2199_v31  ;;  %v2988_v56 = vld [vmem:[%s5678_s3 + $0xf8] sm:$0xff] }
 0x333   :  { %2807 = vmatpush1.bf16.msra.mxu0 %v3964_v55  ;;  %2096 = vmatprep.mubr.bf16.mxu0 %v3447_v21  ;;  %v3517_v16 = vcombine.high %v2190_v32, %v2200_v24  ;;  %v3516_v52 = vcombine.low %v2190_v32, %v2200_v24  ;;  %v2214_v51 = vor.u32 %v2213_v44, %v2209_v59  ;;  %v2219_v1 = vrot.slane %v2217_v50, 5  ;;  %v3973_v32 = vld [vmem:[%s5680_s2 + $0x200] ss:$8 sps:$4 sm:$0xff]  }
 0x334   :  { %2808 = vmatprep.subr.bf16.mxu0 %v3969_v14  ;;  %v5288_v55 = vsel %vm4202_vm5, %v3552_v6, %v2549_v63  ;;  %v2562_v8 = vrot.slane %v5205_v4, 5  ;;  %v2565_v38 = vrot.slane %v5227_v35, 5  ;;  %v3446_v11 = vcombine.low %v5227_v35, %v5239_v23  ;;  %v3975_v14 = vld [vmem:[%s5680_s2 + $0x204] ss:$8 sps:$4 sm:$0xff]   ;;  %v3979_v24 = vld [vmem:[%s5680_s2 + $0x2e0] ss:$8 sps:$4 sm:$0xff]   ;;  %3670 = vmatprep.subr.mxu1 %v2988_v56 }
 0x335   :  { %v5301_v63 = vsel %vm4202_vm5, %v2551_v19, %v2552_v42  ;;  %v2205_v43 = vrot.slane %v2204_v48, 4  ;;  %v2568_v4 = vrot.slane %v5239_v23, 5  ;;  %v2215_v18 = vrot.slane %v2214_v51, 4  ;;  %v3985_v48 = vld [vmem:[%s5680_s2 + $0x2c0] ss:$8 sps:$4 sm:$0xff]  }
 0x336   :  { %2489 = vmatmul.mubr.bf16.gmra.mxu1 %v3514_v22  ;;  %v5309_v36 = vsel %vm4202_vm5, %v3553_v17, %v2562_v8  ;;  %v2564_v35 = vrot.slane %v2562_v8, 4  ;;  %v2567_v3 = vrot.slane %v2565_v38, 4  ;;  %v3587_v21 = vcombine.high %v5288_v55, %v5301_v63  ;;  %v3984_v17 = vld [vmem:[%s5680_s2 + $0x2d4] ss:$8 sps:$4 sm:$0xff]   ;;  %v3993_v8 = vld [vmem:[%s5680_s2 + $0x2a4] ss:$8 sps:$4 sm:$0xff]  }
 0x337   :  { %2498 = vmatprep.mubr.bf16.mxu1 %v3517_v16  ;;  %2809 = vmatpush1.bf16.msra.mxu0 %v3967_v26  ;;  %v2571_v31 = vrot.slane %v5264_v0, 5  ;;  %v2220_v23 = vsel %vm4151_vm2, %v2215_v18, %v2219_v1  ;;  %v2570_v6 = vrot.slane %v2568_v4, 4  ;;  %v2210_v50 = vsel %vm4151_vm2, %v2205_v43, %v2209_v59  ;;  %v3978_v26 = vld [vmem:[%s5680_s2 + $0x2f4] ss:$8 sps:$4 sm:$0xff]   ;;  %v3981_v59 = vld [vmem:[%s5680_s2 + $0x2e4] ss:$8 sps:$4 sm:$0xff]  }
 0x338   :  { %2810 = vmatprep.subr.bf16.mxu0 %v3972_v58  ;;  %v5318_v53 = vsel %vm4202_vm5, %v2564_v35, %v2565_v38  ;;  %v5322_v2 = vsel %vm4202_vm5, %v2567_v3, %v2568_v4  ;;  %v3519_v19 = vcombine.high %v2210_v50, %v2220_v23  ;;  %v3518_v58 = vcombine.low %v2210_v50, %v2220_v23  ;;  %v3982_v16 = vld [vmem:[%s5680_s2 + $0x2d0] ss:$8 sps:$4 sm:$0xff]   ;;  %v3990_v51 = vld [vmem:[%s5680_s2 + $0x2b4] ss:$8 sps:$4 sm:$0xff]   ;;  %v3991_v38 = vld [vmem:[%s5680_s2 + $0x2a0] ss:$8 sps:$4 sm:$0xff]  }
 0x339   :  { %v3591_v0 = vcombine.high %v5309_v36, %v5318_v53  ;;  %v3590_v40 = vcombine.low %v5309_v36, %v5318_v53  ;;  %v2572_v7 = vsel %vm4202_vm5, %v2570_v6, %v2571_v31  ;;  %v3988_v1 = vld [vmem:[%s5680_s2 + $0x2b0] ss:$8 sps:$4 sm:$0xff]   ;;  %v3999_v43 = vld [vmem:[%s5680_s2 + $0x284] ss:$8 sps:$4 sm:$0xff]   ;;  %v2555_v4 = vrot.slane %v5182_v5, 5 }
 0x33a   :  { %2097 = vmatmul.mubr.bf16.gmra.mxu0 %v3446_v11  ;;  %v3593_v44 = vcombine.high %v5322_v2, %v2572_v7  ;;  %v3592_v22 = vcombine.low %v5322_v2, %v2572_v7  ;;  %v3994_v11 = vld [vmem:[%s5680_s2 + $0x290] ss:$8 sps:$4 sm:$0xff]   ;;  %v2558_v18 = vrot.slane %v5218_v45, 5  ;;  %v2554_v36 = vrot.slane %v2552_v42, 4  ;;  %v2970_v23 = vld [vmem:[%s5678_s3 + $0x68] sm:$0xff]  ;;  %v2985_v53 = vld [vmem:[%s5678_s3 + $0xe0] sm:$0xff] }
 0x33b   :  { %2811 = vmatpush1.bf16.msra.mxu0 %v3970_v46  ;;  %2830 = vmatprep.mubr.bf16.mxu0 %v3587_v21  ;;  %v3996_v46 = vld [vmem:[%s5680_s2 + $0x294] ss:$8 sps:$4 sm:$0xff]   ;;  %v2557_v35 = vrot.slane %v2555_v4, 4  ;;  %v3586_v21 = vcombine.low %v5288_v55, %v5301_v63  ;;  %v2986_v63 = vld [vmem:[%s5678_s3 + $0xe8] sm:$0xff]  ;;  %v2969_v2 = vld [vmem:[%s5678_s3 + $0x60] sm:$0xff] }
 0x33c   :  { %2812 = vmatprep.subr.bf16.mxu0 %v3975_v14  ;;  %v3997_v14 = vld [vmem:[%s5680_s2 + $0x280] ss:$8 sps:$4 sm:$0xff]   ;;  %v2556_v5 = vsel %vm4202_vm5, %v2554_v36, %v2555_v4  ;;  %v2972_v42 = vld [vmem:[%s5678_s3 + $0x78] sm:$0xff]  ;;  %v2971_v55 = vld [vmem:[%s5678_s3 + $0x70] sm:$0xff] }
 0x33d   :  { %v2559_v3 = vsel %vm4202_vm5, %v2557_v35, %v2558_v18  ;;  %3671 = vmatpush3.msra.mxu1 %v2972_v42  ;;  %v2967_v6 = vld [vmem:[%s5678_s3 + $0x50] sm:$0xff]  ;;  %v2982_v50 = vld [vmem:[%s5678_s3 + $0xc8] sm:$0xff]  ;;  %v2965_v7 = vld [vmem:[%s5678_s3 + $0x40] sm:$0xff] }
 0x33e   :  { %2499 = vmatmul.mubr.bf16.gmra.mxu1 %v3516_v52  ;;  %v3987_v52 = vld [vmem:[%s5680_s2 + $0x2c4] ss:$8 sps:$4 sm:$0xff]   ;;  %v3589_v45 = vcombine.high %v2556_v5, %v2559_v3  ;;  %v3588_v31 = vcombine.low %v2556_v5, %v2559_v3  ;;  %3672 = vmatprep.subr.mxu1 %v2987_v33 }
 0x33f   :  { %2508 = vmatprep.mubr.bf16.mxu1 %v3519_v19  ;;  %2813 = vmatpush1.bf16.msra.mxu0 %v3973_v32  ;;  %v2984_v32 = vld [vmem:[%s5678_s3 + $0xd8] sm:$0xff]  ;;  %v2981_v19 = vld [vmem:[%s5678_s3 + $0xc0] sm:$0xff] }
 0x340   :  { %2814 = vmatprep.subr.bf16.mxu0 %v3978_v26  ;;  %3673 = vmatpush3.msra.mxu1 %v2971_v55  ;;  %v2966_v26 = vld [vmem:[%s5678_s3 + $0x48] sm:$0xff] }
 0x341   :  { %3674 = vmatprep.subr.mxu1 %v2986_v63 }
 0x342   :  { %3675 = vmatpush3.msra.mxu1 %v2970_v23 }
 0x343   :  { %2815 = vmatpush2.bf16.msra.mxu0 %v3976_v28  ;;  %3676 = vmatprep.subr.mxu1 %v2985_v53  ;;  %v2979_v28 = vld [vmem:[%s5678_s3 + $0xb0] sm:$0xff] }
 0x344   :  { %2816 = vmatprep.subr.bf16.mxu0 %v3981_v59  ;;  %3677 = vmatpush3.msra.mxu1 %v2969_v2  ;;  %v2963_v59 = vld [vmem:[%s5678_s3 + $0x30] sm:$0xff] }
 0x345   :  { %3678 = vmatprep.subr.mxu1 %v2984_v32 }
 0x346   :  { %2509 = vmatmul.mubr.bf16.gmra.mxu1 %v3518_v58  ;;  %v2962_v58 = vld [vmem:[%s5678_s3 + $0x28] sm:$0xff] }
 0x347   :  { %2817 = vmatpush2.bf16.msra.mxu0 %v3979_v24  ;;  %v2978_v24 = vld [vmem:[%s5678_s3 + $0xa8] sm:$0xff] }
 0x348   :  { %2818 = vmatprep.subr.bf16.mxu0 %v3984_v17  ;;  %v2977_v17 = vld [vmem:[%s5678_s3 + $0xa0] sm:$0xff] }
 0x34b   :  { %2819 = vmatpush2.bf16.msra.mxu0 %v3982_v16  ;;  %v2961_v16 = vld [vmem:[%s5678_s3 + $0x20] sm:$0xff] }
 0x34c   :  { %2820 = vmatprep.subr.bf16.mxu0 %v3987_v52  ;;  %v2976_v52 = vld [vmem:[%s5678_s3 + $0x98] sm:$0xff] }
 0x34f   :  { %2821 = vmatpush2.bf16.msra.mxu0 %v3985_v48  ;;  %v2960_v48 = vld [vmem:[%s5678_s3 + $0x18] sm:$0xff] }
 0x350   :  { %2822 = vmatprep.subr.bf16.mxu0 %v3990_v51  ;;  %v2975_v51 = vld [vmem:[%s5678_s3 + $0x90] sm:$0xff] }
 0x353   :  { %2823 = vmatpush2.bf16.msra.mxu0 %v3988_v1  ;;  %v2959_v1 = vld [vmem:[%s5678_s3 + $0x10] sm:$0xff] }
 0x354   :  { %2824 = vmatprep.subr.bf16.mxu0 %v3993_v8  ;;  %v2974_v8 = vld [vmem:[%s5678_s3 + $0x88] sm:$0xff] }
 0x357   :  { %2825 = vmatpush2.bf16.msra.mxu0 %v3991_v38  ;;  %v2958_v38 = vld [vmem:[%s5678_s3 + $0x8] sm:$0xff] }
 0x358   :  { %2826 = vmatprep.subr.bf16.mxu0 %v3996_v46  ;;  %v2973_v46 = vld [vmem:[%s5678_s3 + $0x80] sm:$0xff] }
 0x35b   :  { %2827 = vmatpush2.bf16.msra.mxu0 %v3994_v11  ;;  %v2957_v11 = vld [vmem:[%s5678_s3] sm:$0xff] }
 0x35c   :  { %2828 = vmatprep.subr.bf16.mxu0 %v3999_v43 }
 0x35f   :  { %2829 = vmatpush2.bf16.msra.mxu0 %v3997_v14 }
 0x362   :  { %2831 = vmatmul.mubr.bf16.vlgmr.msra.gmra.mxu0 %v3586_v21 }
 0x363   :  { %2840 = vmatprep.mubr.bf16.mxu0 %v3589_v45 }
 0x36a   :  { %2841 = vmatmul.mubr.bf16.gmra.mxu0 %v3588_v31 }
 0x36b   :  { %2850 = vmatprep.mubr.bf16.mxu0 %v3591_v0  ;;  %v2968_v0 = vld [vmem:[%s5678_s3 + $0x58] sm:$0xff] }
 0x36c   :  { %3679 = vmatpush3.msra.mxu1 %v2968_v0 }
 0x372   :  { %2851 = vmatmul.mubr.bf16.gmra.mxu0 %v3590_v40  ;;  %v2983_v40 = vld [vmem:[%s5678_s3 + $0xd0] sm:$0xff] }
 0x373   :  { %2860 = vmatprep.mubr.bf16.mxu0 %v3593_v44  ;;  %3680 = vmatprep.subr.mxu1 %v2983_v40  ;;  %v2980_v44 = vld [vmem:[%s5678_s3 + $0xb8] sm:$0xff] }
 0x374   :  { %3681 = vmatpush3.msra.mxu1 %v2967_v6 }
 0x375   :  { %3682 = vmatprep.subr.mxu1 %v2982_v50 }
 0x376   :  { %3683 = vmatpush3.msra.mxu1 %v2966_v26 }
 0x377   :  { %3684 = vmatprep.subr.mxu1 %v2981_v19 }
 0x378   :  { %3685 = vmatpush3.msra.mxu1 %v2965_v7 }
 0x379   :  { %3686 = vmatprep.subr.mxu1 %v2980_v44 }
 0x37a   :  { %2861 = vmatmul.mubr.bf16.gmra.mxu0 %v3592_v22  ;;  %v2964_v22 = vld [vmem:[%s5678_s3 + $0x38] sm:$0xff] }
 0x37b   :  { %3687 = vmatpush3.msra.mxu1 %v2964_v22 }
 0x37c   :  { %3688 = vmatprep.subr.mxu1 %v2979_v28 }
 0x37d   :  { %3689 = vmatpush3.msra.mxu1 %v2963_v59 }
 0x37e   :  { %3690 = vmatprep.subr.mxu1 %v2978_v24 }
 0x37f   :  { %3691 = vmatpush3.msra.mxu1 %v2962_v58 }
 0x380   :  { %3692 = vmatprep.subr.mxu1 %v2977_v17 }
 0x381   :  { %3693 = vmatpush3.msra.mxu1 %v2961_v16 }
 0x382   :  { %3694 = vmatprep.subr.mxu1 %v2976_v52 }
 0x383   :  { %3695 = vmatpush3.msra.mxu1 %v2960_v48  ;;  %v1272_v48 = vadd.f32 %v4967_v10, %v4858_v57 }
 0x384   :  { %3696 = vmatprep.subr.mxu1 %v2975_v51 }
 0x385   :  { %3697 = vmatpush3.msra.mxu1 %v2959_v1 }
 0x386   :  { %3698 = vmatprep.subr.mxu1 %v2974_v8 }
 0x387   :  { %3699 = vmatpush3.msra.mxu1 %v2958_v38 }
 0x388   :  { %3700 = vmatprep.subr.mxu1 %v2973_v46 }
 0x389   :  { %3701 = vmatpush3.msra.mxu1 %v2957_v11 }
 0x3e2   :  { %v2068_v43 = vpop.f32.mrf.mxu0 }
 0x3e3   :  { %v2107_v17 = vadd.f32 %v2068_v43, %v4861_v12 }
 0x3e4   :  { %v2070_v4 = vpop.f32.mrf.mxu0 }
 0x3e5   :  { %v2108_v16 = vadd.f32 %v2070_v4, %v4864_v15 }
 0x3e6   :  { %v2072_v18 = vpop.f32.mrf.mxu0 }
 0x3e7   :  { %v2109_v24 = vadd.f32 %v2072_v18, %v4867_v27 }
 0x3e8   :  { %v2074_v14 = vpop.f32.mrf.mxu0 }
 0x3e9   :  { %v2110_v51 = vadd.f32 %v2074_v14, %v4871_v30 }
 0x3ea   :  { %v2078_v36 = vpop.f32.mrf.mxu0 }
 0x3eb   :  { %v2111_v1 = vadd.f32 %v2078_v36, %v4875_v20 }
 0x3ec   :  { %v2080_v35 = vpop.f32.mrf.mxu0 }
 0x3ed   :  { %v2112_v11 = vadd.f32 %v2080_v35, %v4878_v37 }
 0x3ee   :  { %v2082_v3 = vpop.f32.mrf.mxu0  ;;  %v2480_v21 = vpop.f32.mrf.mxu1 }
 0x3ef   :  { %v2519_v46 = vadd.f32 %v2480_v21, %v2107_v17  ;;  %v2113_v27 = vadd.f32 %v2082_v3, %v4881_v29 }
 0x3f0   :  { %v2084_v5 = vpop.f32.mrf.mxu0  ;;  %v2482_v45 = vpop.f32.mrf.mxu1 }
 0x3f1   :  { %v2520_v41 = vadd.f32 %v2482_v45, %v2108_v16  ;;  %v2114_v12 = vadd.f32 %v2084_v5, %v4884_v13 }
 0x3f2   :  { %v2088_v31 = vpop.f32.mrf.mxu0  ;;  %v2484_v56 = vpop.f32.mrf.mxu1 }
 0x3f3   :  { %v2521_v8 = vadd.f32 %v2484_v56, %v2109_v24  ;;  %v2115_v57 = vadd.f32 %v2088_v31, %v4887_v47 }
 0x3f4   :  { %v2090_v42 = vpop.f32.mrf.mxu0  ;;  %v2486_v33 = vpop.f32.mrf.mxu1 }
 0x3f5   :  { %v2522_v43 = vadd.f32 %v2486_v33, %v2110_v51  ;;  %v2116_v30 = vadd.f32 %v2090_v42, %v4890_v54 }
 0x3f6   :  { %v2092_v55 = vpop.f32.mrf.mxu0  ;;  %v2490_v63 = vpop.f32.mrf.mxu1 }
 0x3f7   :  { %v2523_v15 = vadd.f32 %v2490_v63, %v2111_v1  ;;  %v2117_v20 = vadd.f32 %v2092_v55, %v4893_v9 }
 0x3f8   :  { %v2094_v23 = vpop.f32.mrf.mxu0  ;;  %v2492_v53 = vpop.f32.mrf.mxu1 }
 0x3f9   :  { %v2524_v37 = vadd.f32 %v2492_v53, %v2112_v11  ;;  %v2118_v3 = vadd.f32 %v2094_v23, %v4895_v34 }
 0x3fa   :  { %v2098_v2 = vpop.f32.mrf.mxu0  ;;  %v2494_v32 = vpop.f32.mrf.mxu1 }
 0x3fb   :  { %v2525_v36 = vadd.f32 %v2494_v32, %v2113_v27  ;;  %v2119_v5 = vadd.f32 %v2098_v2, %v4897_v60 }
 0x3fc   :  { %v2100_v0 = vpop.f32.mrf.mxu0  ;;  %v2496_v40 = vpop.f32.mrf.mxu1 }
 0x3fd   :  { %v2526_v21 = vadd.f32 %v2496_v40, %v2114_v12  ;;  %v2120_v42 = vadd.f32 %v2100_v0, %v4899_v62 }
 0x3fe   :  { %v2102_v6 = vpop.f32.mrf.mxu0  ;;  %v2500_v50 = vpop.f32.mrf.mxu1 }
 0x3ff   :  { %v2527_v54 = vadd.f32 %v2500_v50, %v2115_v57  ;;  %v2121_v55 = vadd.f32 %v2102_v6, %v4901_v49 }
 0x400   :  { %v2104_v26 = vpop.f32.mrf.mxu0  ;;  %v2502_v7 = vpop.f32.mrf.mxu1 }
 0x401   :  { %v2528_v33 = vadd.f32 %v2502_v7, %v2116_v30  ;;  %v2122_v62 = vadd.f32 %v2104_v26, %v1272_v48 }
 0x402   :  { %v2504_v28 = vpop.f32.mrf.mxu1 }
 0x403   :  { %v2529_v32 = vadd.f32 %v2504_v28, %v2117_v20 }
 0x404   :  { %v2506_v52 = vpop.f32.mrf.mxu1 }
 0x406   :  { %v2510_v10 = vpop.f32.mrf.mxu1 }
 0x407   :  { %v2531_v51 = vadd.f32 %v2510_v10, %v2119_v5 }
 0x408   :  { %v2512_v34 = vpop.f32.mrf.mxu1 }
 0x422   :  { %v2832_v19 = vpop.f32.mrf.mxu0 }
 0x423   :  { %v5506_v14 = vadd.f32 %v2832_v19, %v2519_v46 }
 0x424   :  { %v2834_v44 = vpop.f32.mrf.mxu0 }
 0x425   :  { %v5514_v47 = vadd.f32 %v2834_v44, %v2520_v41  ;;  %v2913_v60 = vmul.f32 %v5506_v14, %v5506_v14  ;;  %v2530_v44 = vadd.f32 %v2506_v52, %v2118_v3 }
 0x426   :  { %v2836_v22 = vpop.f32.mrf.mxu0 }
 0x427   :  { %v5501_v4 = vadd.f32 %v2836_v22, %v2521_v8  ;;  %v2914_v49 = vmul.f32 %v5514_v47, %v5514_v47  ;;  %v2514_v22 = vpop.f32.mrf.mxu1 }
 0x428   :  { %v2838_v59 = vpop.f32.mrf.mxu0  ;;  %v2533_v20 = vadd.f32 %v2514_v22, %v2121_v55 }
 0x429   :  { %v5508_v35 = vadd.f32 %v2838_v59, %v2522_v43  ;;  %v2915_v9 = vmul.f32 %v5501_v4, %v5501_v4  ;;  %v2887_v0 = vadd.f32 %v5501_v4, %v5506_v14  ;;  %v2532_v43 = vadd.f32 %v2512_v34, %v2120_v42 }
 0x42a   :  { %v2842_v58 = vpop.f32.mrf.mxu0 }
 0x42b   :  { %v5510_v29 = vadd.f32 %v2842_v58, %v2523_v15  ;;  %v2916_v41 = vmul.f32 %v5508_v35, %v5508_v35  ;;  %v2929_v40 = vadd.f32 %v2915_v9, %v2913_v60  ;;  %v2900_v26 = vadd.f32 %v5508_v35, %v5514_v47  ;;  %v2516_v15 = vpop.f32.mrf.mxu1 }
 0x42c   :  { %v2844_v38 = vpop.f32.mrf.mxu0  ;;  %v2534_v9 = vadd.f32 %v2516_v15, %v2122_v62 }
 0x42d   :  { %v5518_v45 = vadd.f32 %v2844_v38, %v2524_v37  ;;  %v2917_v63 = vmul.f32 %v5510_v29, %v5510_v29  ;;  %v2888_v28 = vadd.f32 %v2887_v0, %v5510_v29  ;;  %v2942_v24 = vadd.f32 %v2916_v41, %v2914_v49 }
 0x42e   :  { %v2846_v18 = vpop.f32.mrf.mxu0 }
 0x42f   :  { %v5520_v31 = vadd.f32 %v2846_v18, %v2525_v36  ;;  %v2918_v6 = vmul.f32 %v5518_v45, %v5518_v45  ;;  %v2930_v58 = vadd.f32 %v2929_v40, %v2917_v63  ;;  %v2901_v52 = vadd.f32 %v2900_v26, %v5518_v45 }
 0x430   :  { %v2848_v13 = vpop.f32.mrf.mxu0 }
 0x431   :  { %v5530_v23 = vadd.f32 %v2848_v13, %v2526_v21  ;;  %v2919_v50 = vmul.f32 %v5520_v31, %v5520_v31  ;;  %v2889_v1 = vadd.f32 %v2888_v28, %v5520_v31  ;;  %v2943_v38 = vadd.f32 %v2942_v24, %v2918_v6 }
 0x432   :  { %v2852_v56 = vpop.f32.mrf.mxu0 }
 0x433   :  { %v5532_v53 = vadd.f32 %v2852_v56, %v2527_v54  ;;  %v2920_v17 = vmul.f32 %v5530_v23, %v5530_v23  ;;  %v2931_v46 = vadd.f32 %v2930_v58, %v2919_v50  ;;  %v2902_v18 = vadd.f32 %v2901_v52, %v5530_v23 }
 0x434   :  { %v2854_v2 = vpop.f32.mrf.mxu0 }
 0x435   :  { %v5542_v19 = vadd.f32 %v2854_v2, %v2528_v33  ;;  %v2921_v16 = vmul.f32 %v5532_v53, %v5532_v53  ;;  %v2890_v57 = vadd.f32 %v2889_v1, %v5532_v53  ;;  %v2944_v10 = vadd.f32 %v2943_v38, %v2920_v17 }
 0x436   :  { %v2856_v7 = vpop.f32.mrf.mxu0 }
 0x437   :  { %v5547_v59 = vadd.f32 %v2856_v7, %v2529_v32  ;;  %v2922_v11 = vmul.f32 %v5542_v19, %v5542_v19  ;;  %v2932_v37 = vadd.f32 %v2931_v46, %v2921_v16  ;;  %v2903_v3 = vadd.f32 %v2902_v18, %v5542_v19 }
 0x438   :  { %v2858_v48 = vpop.f32.mrf.mxu0 }
 0x439   :  { %v5555_v8 = vadd.f32 %v2858_v48, %v2530_v44  ;;  %v2923_v27 = vmul.f32 %v5547_v59, %v5547_v59  ;;  %v2891_v21 = vadd.f32 %v2890_v57, %v5547_v59  ;;  %v2945_v56 = vadd.f32 %v2944_v10, %v2922_v11 }
 0x43a   :  { %v2862_v12 = vpop.f32.mrf.mxu0 }
 0x43b   :  { %v5563_v30 = vadd.f32 %v2862_v12, %v2531_v51  ;;  %v2924_v36 = vmul.f32 %v5555_v8, %v5555_v8  ;;  %v2933_v42 = vadd.f32 %v2932_v37, %v2923_v27  ;;  %v2904_v55 = vadd.f32 %v2903_v3, %v5555_v8 }
 0x43c   :  { %v2864_v13 = vpop.f32.mrf.mxu0 }
 0x43d   :  { %v2925_v5 = vmul.f32 %v5563_v30, %v5563_v30  ;;  %v5571_v54 = vadd.f32 %v2864_v13, %v2532_v43  ;;  %v2892_v34 = vadd.f32 %v2891_v21, %v5563_v30  ;;  %v2946_v63 = vadd.f32 %v2945_v56, %v2924_v36  ;;  %v3097_v56 = vld [vmem:[%s5679_s4] sm:$0xff] }
 0x43e   :  { %v2866_v33 = vpop.f32.mrf.mxu0 }
 0x43f   :  { %v2926_v60 = vmul.f32 %v5571_v54, %v5571_v54  ;;  %v5577_v41 = vadd.f32 %v2866_v33, %v2533_v20  ;;  %v2934_v2 = vadd.f32 %v2933_v42, %v2925_v5  ;;  %v2905_v49 = vadd.f32 %v2904_v55, %v5571_v54 }
 0x440   :  { %v2868_v32 = vpop.f32.mrf.mxu0  ;;  %v5729_v5 = vmov 0.0  }
 0x441   :  { %v2893_v0 = vadd.f32 %v2892_v34, %v5577_v41  ;;  %v2927_v62 = vmul.f32 %v5577_v41, %v5577_v41  ;;  %v5583_v40 = vadd.f32 %v2868_v32, %v2534_v9  ;;  %v2947_v6 = vadd.f32 %v2946_v63, %v2926_v60  ;;  %v3098_v9 = vld [vmem:[%s5679_s4 + $0x8] sm:$0xff] }
 0x442   :  { %3132 = vmatprep.subr.mxu1 %v3098_v9 }
 0x443   :  { %v2894_v50 = vrot.slane %v2893_v0, 4  ;;  %v2935_v7 = vadd.f32 %v2934_v2, %v2927_v62  ;;  %v2906_v44 = vadd.f32 %v2905_v49, %v5583_v40  ;;  %v2928_v22 = vmul.f32 %v5583_v40, %v5583_v40 }
 0x445   :  { %v2895_v26 = vadd.f32 %v2894_v50, %v2893_v0  ;;  %v2936_v28 = vrot.slane %v2935_v7, 4  ;;  %v2907_v24 = vrot.slane %v2906_v44, 4  ;;  %v2948_v58 = vadd.f32 %v2947_v6, %v2928_v22  ;;  %v3066_v50 = vld [vmem:[%s5683_s7] sm:$0x1] }
 0x446   :  { %v3087_v22 = vld [vmem:[%s5684_s8] sm:$0x1] }
 0x447   :  { %v2896_v17 = vrot.slane %v2895_v26, 2  ;;  %v2937_v16 = vadd.f32 %v2936_v28, %v2935_v7  ;;  %v2908_v48 = vadd.f32 %v2907_v24, %v2906_v44  ;;  %v2949_v51 = vrot.slane %v2948_v58, 4 }
 0x449   :  { %v2938_v52 = vrot.slane %v2937_v16, 2  ;;  %v2909_v1 = vrot.slane %v2908_v48, 2  ;;  %v2950_v38 = vadd.f32 %v2949_v51, %v2948_v58  ;;  %v2897_v46 = vadd.f32 %v2896_v17, %v2895_v26 }
 0x44b   :  { %v2939_v11 = vadd.f32 %v2938_v52, %v2937_v16  ;;  %v2910_v27 = vadd.f32 %v2909_v1, %v2908_v48  ;;  %v2951_v12 = vrot.slane %v2950_v38, 2  ;;  %v2898_v57 = vrot.slane %v2897_v46, 1 }
 0x44d   :  { %v2911_v43 = vrot.slane %v2910_v27, 1  ;;  %v2952_v15 = vadd.f32 %v2951_v12, %v2950_v38  ;;  %v2940_v18 = vrot.slane %v2939_v11, 1  ;;  %v2899_v13 = vadd.f32 %v2898_v57, %v2897_v46 }
 0x44f   :  { %v2953_v20 = vrot.slane %v2952_v15, 1  ;;  %v2941_v10 = vadd.f32 %v2940_v18, %v2939_v11  ;;  %v2912_v37 = vadd.f32 %v2911_v43, %v2910_v27 }
 0x451   :  { %v2954_v36 = vadd.f32 %v2953_v20, %v2952_v15  ;;  %v2955_v21 = vsel %vm1341_vm6, %v2899_v13, %v2941_v10 }
 0x453   :  { %v2956_v3 = vsel %vm1341_vm6, %v2912_v37, %v2954_v36 }
 0x454   :  { %3053 = vmatprep.mubr.f32.mxu1 %v2956_v3 }
 0x455   :  { %3054 = vmatmul.mubr.f32.vlgmr.msra.gmra.mxu1 %v2955_v21 }
 0x456   :  { %3166 = vmatprep.mubr.f32.mxu1 %v5729_v5  ;;  %3133 = vmatpush1.msra.mxu1 %v3097_v56 }
 0x515   :  { %v3702_v42 = vpop.f32.mrf.mxu1 }
 0x517   :  { %v3703_v33 = vpop.f32.mrf.mxu1 }
 0x518   :  { %v3704_v55 = vadd.f32 %v3703_v33, %v3702_v42 }
 0x51a   :  { %v3059_v34 = vmul.f32 0.00048828125, %v3704_v55 }
 0x51c   :  { %v3060_v60 = vmul.f32 %v3059_v34, %v3059_v34 }
 0x51e   :  { %v3062_v63 = vrot.slane %v3060_v60, 7 }
 0x520   :  { %v3064_v2 = vsub.f32 %v3059_v34, %v3062_v63 }
 0x522   :  { %v3065_v32 = vmax.f32 %v3064_v2, 0.0 }
 0x524   :  { %v3067_v49 = vadd.f32 1e-05, %v3065_v32 }
 0x526   :  { %4002 = vrsqrt.f32 %v3067_v49 }
 0x533   :  { %v4003_v0 = vpop.eup %4002 }
 0x534   :  { %v3076_v62 = vrot.slane %v4003_v0, %v4972_v61 }
 0x536   :  { %v3077_v6 = vcombine.high %v3076_v62, %v3076_v62 }
 0x538   :  { %v3084_v7 = vrot.slane %v3077_v6, %v4972_v61 }
 0x53a   :  { %v3086_v44 = vmul.f32 %v3084_v7, %v3066_v50 }
 0x53c   :  { %v3088_v26 = vmul.f32 %v3086_v44, %v3059_v34 }
 0x53e   :  { %v3089_v28 = vsub.f32 %v3087_v22, %v3088_v26 }
 0x540   :  { %v3094_v24 = vrot.slane %v3089_v28, %v4983_v39 }
 0x542   :  { %v3096_v58 = vsel %vm1341_vm6, %v3086_v44, %v3094_v24 }
 0x543   :  { %3626 = vmatmul.mubr.msk.f32.vlgmr.msra.gmra.mxu1 %vm1486_vm11, %v3096_v58 }
 0x603   :  { %v3168_v17 = vpop.f32.mrf.mxu1 }
 0x604   :  { %v3176_v16 = vrot.slane %v3168_v17, %v4983_v39  ;;  %v3200_v48 = vrot.slane %v3168_v17, %v5127_v25 }
 0x605   :  { %v3170_v10 = vpop.f32.mrf.mxu1 }
 0x606   :  { %v3181_v61 = vmul.f32 %v3176_v16, %v5506_v14  ;;  %v3183_v51 = vmul.f32 %v3176_v16, %v5501_v4  ;;  %v3185_v52 = vmul.f32 %v3176_v16, %v5510_v29  ;;  %v3187_v1 = vmul.f32 %v3176_v16, %v5520_v31 }
 0x607   :  { %v3189_v38 = vmul.f32 %v3176_v16, %v5532_v53  ;;  %v3191_v46 = vmul.f32 %v3176_v16, %v5547_v59  ;;  %v3193_v11 = vmul.f32 %v3176_v16, %v5563_v30  ;;  %v3195_v27 = vmul.f32 %v3176_v16, %v5577_v41 }
 0x608   :  { %v3205_v12 = vadd.f32 %v3200_v48, %v3181_v61  ;;  %v3207_v43 = vadd.f32 %v3200_v48, %v3183_v51  ;;  %v3209_v15 = vadd.f32 %v3200_v48, %v3185_v52  ;;  %v3211_v18 = vadd.f32 %v3200_v48, %v3187_v1 }
 0x609   :  { %v3213_v57 = vadd.f32 %v3200_v48, %v3189_v38  ;;  %v3215_v14 = vadd.f32 %v3200_v48, %v3191_v46  ;;  %v3217_v20 = vadd.f32 %v3200_v48, %v3193_v11  ;;  %v3219_v4 = vadd.f32 %v3200_v48, %v3195_v27 }
 0x60a   :  { %v3221_v29 = vmax.f32 %v3205_v12, 0.0  ;;  %v3223_v37 = vmax.f32 %v3207_v43, 0.0  ;;  %v3225_v31 = vmax.f32 %v3209_v15, 0.0  ;;  %v3227_v36 = vmax.f32 %v3211_v18, 0.0 }
 0x60b   :  { %v3229_v53 = vmax.f32 %v3213_v57, 0.0  ;;  %v3231_v13 = vmax.f32 %v3215_v14, 0.0  ;;  %v3233_v59 = vmax.f32 %v3217_v20, 0.0  ;;  %v3235_v3 = vmax.f32 %v3219_v4, 0.0 }
 0x60c   :  { %3237 = vst [vmem:[%s5685_s9] sm:$0xff] %v3221_v29  ;;  %3239 = vst [vmem:[%s5685_s9 + $0x10] sm:$0xff] %v3223_v37  ;;  %v3180_v30 = vrot.slane %v3170_v10, %v4983_v39  ;;  %v3204_v41 = vrot.slane %v3170_v10, %v5127_v25 }
 0x60d   :  { %3241 = vst [vmem:[%s5685_s9 + $0x20] sm:$0xff] %v3225_v31  ;;  %3243 = vst [vmem:[%s5685_s9 + $0x30] sm:$0xff] %v3227_v36 }
 0x60e   :  { %3245 = vst [vmem:[%s5685_s9 + $0x40] sm:$0xff] %v3229_v53  ;;  %3247 = vst [vmem:[%s5685_s9 + $0x50] sm:$0xff] %v3231_v13  ;;  %v3182_v39 = vmul.f32 %v3180_v30, %v5514_v47  ;;  %v3184_v21 = vmul.f32 %v3180_v30, %v5508_v35  ;;  %v3186_v5 = vmul.f32 %v3180_v30, %v5518_v45 }
 0x60f   :  { %3249 = vst [vmem:[%s5685_s9 + $0x60] sm:$0xff] %v3233_v59  ;;  %3251 = vst [vmem:[%s5685_s9 + $0x70] sm:$0xff] %v3235_v3  ;;  %v3188_v9 = vmul.f32 %v3180_v30, %v5530_v23  ;;  %v3190_v56 = vmul.f32 %v3180_v30, %v5542_v19  ;;  %v3192_v42 = vmul.f32 %v3180_v30, %v5555_v8 }
 0x610   :  { %v3194_v33 = vmul.f32 %v3180_v30, %v5571_v54  ;;  %v3196_v55 = vmul.f32 %v3180_v30, %v5583_v40  ;;  %v3206_v34 = vadd.f32 %v3204_v41, %v3182_v39  ;;  %v3208_v60 = vadd.f32 %v3204_v41, %v3184_v21 }
 0x611   :  { %v3210_v63 = vadd.f32 %v3204_v41, %v3186_v5  ;;  %v3212_v25 = vadd.f32 %v3204_v41, %v3188_v9  ;;  %v3214_v2 = vadd.f32 %v3204_v41, %v3190_v56  ;;  %v3216_v47 = vadd.f32 %v3204_v41, %v3192_v42 }
 0x612   :  { %v3218_v32 = vadd.f32 %v3204_v41, %v3194_v33  ;;  %v3220_v35 = vadd.f32 %v3204_v41, %v3196_v55  ;;  %v3222_v49 = vmax.f32 %v3206_v34, 0.0  ;;  %v3224_v45 = vmax.f32 %v3208_v60, 0.0 }
 0x613   :  { %v3226_v0 = vmax.f32 %v3210_v63, 0.0  ;;  %v3228_v23 = vmax.f32 %v3212_v25, 0.0  ;;  %v3230_v62 = vmax.f32 %v3214_v2, 0.0  ;;  %v3232_v19 = vmax.f32 %v3216_v47, 0.0 }
 0x614   :  { %v3234_v6 = vmax.f32 %v3218_v32, 0.0  ;;  %v3236_v8 = vmax.f32 %v3220_v35, 0.0  ;;  %3238 = vst [vmem:[%s5685_s9 + $0x8] sm:$0xff] %v3222_v49  ;;  %3240 = vst [vmem:[%s5685_s9 + $0x18] sm:$0xff] %v3224_v45 }
 0x615   :  { %3242 = vst [vmem:[%s5685_s9 + $0x28] sm:$0xff] %v3226_v0  ;;  %3244 = vst [vmem:[%s5685_s9 + $0x38] sm:$0xff] %v3228_v23 }
 0x616   :  { %3246 = vst [vmem:[%s5685_s9 + $0x48] sm:$0xff] %v3230_v62  ;;  %3248 = vst [vmem:[%s5685_s9 + $0x58] sm:$0xff] %v3232_v19 }
 0x617   :  { %3250 = vst [vmem:[%s5685_s9 + $0x68] sm:$0xff] %v3234_v6  ;;  %3252 = vst [vmem:[%s5685_s9 + $0x78] sm:$0xff] %v3236_v8 }

</bundles_post_ra>
